<compile_context>
chip_gen: v7x
topology: tpu7x:2x2x1
jax: 0.10.0
libtpu: 0.0.40
codegen_flags: <defaults>
</compile_context>

<pallas_src>
import jax
import jax.numpy as jnp
import numpy as np
from jax import lax
from jax.experimental import pallas as pl
from jax.experimental.pallas import tpu as pltpu

# ----------------------------- configuration --------------------------------
B       = 2          # batch
T_ENC   = 8          # encoder time steps
U       = 4          # target length
U1      = U + 1      # decoder steps (SOS prepended)
U1_PAD  = 8          # pad U+1 -> 8 so U1_PAD * NCLS = 128 lanes (lane-dense output slab)
VOCAB   = 15         # real labels 0..14
NCLS    = VOCAB + 1  # vocab + blank
H_PRED  = 32         # prediction-net hidden size == embedding dim
H_ENC   = 32         # encoder feature dim
H_JOINT = 32         # joint hidden size
L       = 2          # prediction-net LSTM layers

BF16 = jnp.bfloat16


# ----------------------------- fused kernel ---------------------------------
def _fused_kernel(tgt_ref,                        # (U1*B, 1) int32, -1 marks SOS rows
                  enc_ref,                        # (B*T, H_ENC) bf16
                  h0_ref, c0_ref,                 # (L, B, H) f32
                  tab0_ref,                       # (NCLS, 4H) bf16  = embedding @ W_ih0
                  whh0_ref, wih1_ref, whh1_ref,   # (H, 4H) bf16 each
                  b0_ref, b1_ref,                 # (1, 4H) f32 each
                  wenc_ref, benc_ref,             # (H_ENC, Hj) bf16 / (1, Hj) f32
                  wpred_ref, bpred_ref,           # (H_PRED, Hj) bf16 / (1, Hj) f32
                  wout_ref, bout_ref,             # (Hj, NCLS) bf16 / (1, NCLS) f32
                  out_ref,                        # (B, T, U1_PAD*NCLS) f32
                  state_ref):                     # (B, 2*L*H) f32
    # ---- embedding lookup folded into the layer-0 input projection ---------
    ids = tgt_ref[...]                                                  # (U1*B, 1)
    lanes = lax.broadcasted_iota(jnp.int32, (U1 * B, NCLS), 1)
    onehot = (lanes == ids).astype(BF16)                                # SOS rows all-zero
    ig0_all = jnp.dot(onehot, tab0_ref[...],
                      preferred_element_type=jnp.float32)               # (U1*B, 4H)

    whh0 = whh0_ref[...]
    wih1 = wih1_ref[...]
    whh1 = whh1_ref[...]
    b0 = b0_ref[...]
    b1 = b1_ref[...]

    def cell(gates, c_prev):
        # one full-vreg sigmoid covers the i/f/o lanes (cheaper than 3 sliced sigmoids);
        # gate order is (i, f, g, o) as in torch.nn.LSTM weight layout.
        sg = jax.nn.sigmoid(gates)
        i_g = sg[:, 0 * H_PRED:1 * H_PRED]
        f_g = sg[:, 1 * H_PRED:2 * H_PRED]
        o_g = sg[:, 3 * H_PRED:4 * H_PRED]
        g_g = jnp.tanh(gates[:, 2 * H_PRED:3 * H_PRED])
        c_new = f_g * c_prev + i_g * g_g
        h_new = o_g * jnp.tanh(c_new)
        return h_new, c_new

    # ---- prediction net: 2-layer LSTM, batched over B, unrolled over U1 ----
    h = [h0_ref[l] for l in range(L)]                                   # each (B, H) f32
    c = [c0_ref[l] for l in range(L)]
    ys = []
    for t in range(U1):                                                 # static unroll (5)
        g0 = (ig0_all[t * B:(t + 1) * B, :]
              + jnp.dot(h[0].astype(BF16), whh0, preferred_element_type=jnp.float32)
              + b0)
        h[0], c[0] = cell(g0, c[0])
        g1 = (jnp.dot(h[0].astype(BF16), wih1, preferred_element_type=jnp.float32)
              + jnp.dot(h[1].astype(BF16), whh1, preferred_element_type=jnp.float32)
              + b1)
        h[1], c[1] = cell(g1, c[1])
        ys.append(h[1])

    # packed, lane-dense final state: lanes [h0 | h1 | c0 | c1] -> one unmasked store
    state_ref[...] = jnp.concatenate([h[0], h[1], c[0], c[1]], axis=1)  # (B, 128)

    # ---- joint network ------------------------------------------------------
    f = (jnp.dot(enc_ref[...], wenc_ref[...],
                 preferred_element_type=jnp.float32) + benc_ref[...])   # (B*T, Hj)
    dec_all = jnp.concatenate(ys, axis=0).astype(BF16)                  # (U1*B, H)
    g_all = (jnp.dot(dec_all, wpred_ref[...],
                     preferred_element_type=jnp.float32) + bpred_ref[...])  # (U1*B, Hj)

    f3 = f.reshape(B, T_ENC, H_JOINT)                                   # free split
    z_rows = []
    for u in range(U1):
        g_u = g_all[u * B:(u + 1) * B, :]                               # (B, Hj)
        z_u = jnp.maximum(f3 + g_u[:, None, :], 0.0)                    # (B, T, Hj)
        z_rows.append(z_u.reshape(B * T_ENC, H_JOINT))                  # free merge
    z2 = jnp.concatenate(z_rows, axis=0)                                # (U1*B*T, Hj) = (80, 32)

    # ONE batched output projection + ONE batched log-softmax
    logits = (jnp.dot(z2.astype(BF16), wout_ref[...],
                      preferred_element_type=jnp.float32) + bout_ref[...])   # (80, NCLS)
    m = jnp.max(logits, axis=-1, keepdims=True)
    s = logits - m
    logp = s - jnp.log(jnp.sum(jnp.exp(s), axis=-1, keepdims=True))

    # assemble the lane-dense slab: row = (b, t), lanes = u*NCLS + class
    pieces = [logp[u * B * T_ENC:(u + 1) * B * T_ENC, :] for u in range(U1)]
    pieces.append(jnp.zeros((B * T_ENC, (U1_PAD - U1) * NCLS), jnp.float32))
    slab = jnp.concatenate(pieces, axis=1)                              # (B*T, 128)
    out_ref[...] = slab.reshape(B, T_ENC, U1_PAD * NCLS)                # unmasked 128-lane store


def rnnt_fused_call(tgt_col, enc_btd, h0, c0, tab0, w_hh0, w_ih1, w_hh1, b0, b1,
                    w_enc, b_enc, w_pred, b_pred, w_out, b_out):
    vmem = pl.BlockSpec(memory_space=pltpu.MemorySpace.VMEM)
    return pl.pallas_call(
        _fused_kernel,
        out_shape=(
            jax.ShapeDtypeStruct((B, T_ENC, U1_PAD * NCLS), jnp.float32),
            jax.ShapeDtypeStruct((B, 2 * L * H_PRED), jnp.float32),
        ),
        in_specs=[vmem] * 16,
        out_specs=(vmem, vmem),
    )(tgt_col, enc_btd, h0, c0, tab0, w_hh0, w_ih1, w_hh1, b0, b1,
      w_enc, b_enc, w_pred, b_pred, w_out, b_out)


# ----------------------------- full forward ---------------------------------
def rnnt_decoder_joint_forward(encoder_outputs, targets, target_length,
                               input_states_1, input_states_2, p):
    # ---- weight-only preprocessing (XLA; cacheable, outside the kernel) ----
    w_ih0 = p['w_xh'][0, :H_PRED, :]
    w_hh0 = p['w_xh'][0, H_PRED:, :]
    w_ih1 = p['w_xh'][1, :H_PRED, :]
    w_hh1 = p['w_xh'][1, H_PRED:, :]
    tab0 = (p['embedding'] @ w_ih0).astype(BF16)        # embedding folded into layer-0 W_ih
    b0 = p['b_rnn'][0]
    b1 = p['b_rnn'][1]

    # ---- layout plumbing (XLA) ----------------------------------------------
    enc_btd = (jnp.transpose(encoder_outputs, (0, 2, 1))
               .reshape(B * T_ENC, H_ENC).astype(BF16))                 # (B*T, D) lane-dense
    tgt_col = jnp.concatenate(
        [jnp.full((1, B), -1, jnp.int32), targets.astype(jnp.int32).T],
        axis=0).reshape(U1 * B, 1)                                      # row t*B+b; -1 = SOS

    slab, state = rnnt_fused_call(
        tgt_col, enc_btd, input_states_1, input_states_2,
        tab0, w_hh0.astype(BF16), w_ih1.astype(BF16), w_hh1.astype(BF16), b0, b1,
        p['w_enc'].astype(BF16), p['b_enc'], p['w_pred'].astype(BF16), p['b_pred'],
        p['w_out'].astype(BF16), p['b_out'])

    # drop the U1 padding / split classes out of the lane-dense slab (XLA)
    log_probs = slab.reshape(B, T_ENC, U1_PAD, NCLS)[:, :, :U1, :]
    hT = jnp.stack([state[:, 0 * H_PRED:1 * H_PRED],
                    state[:, 1 * H_PRED:2 * H_PRED]], axis=0)           # (L, B, H)
    cT = jnp.stack([state[:, 2 * H_PRED:3 * H_PRED],
                    state[:, 3 * H_PRED:4 * H_PRED]], axis=0)
    return log_probs, target_length, hT, cT


# ----------------------------- pure-JAX reference ---------------------------
def reference_forward(encoder_outputs, targets, target_length, h0, c0, p):
    emb = jnp.take(p['embedding'], targets, axis=0)                    # (B, U, H)
    dec_in = jnp.concatenate([jnp.zeros((B, 1, H_PRED), jnp.float32), emb], axis=1)
    h, c = h0, c0
    ys = []
    for t in range(U1):
        x = dec_in[:, t, :]
        h_new, c_new = [], []
        for l in range(L):
            xh = jnp.concatenate([x, h[l]], axis=-1)
            gates = xh @ p['w_xh'][l] + p['b_rnn'][l, 0]
            i_g = jax.nn.sigmoid(gates[:, 0 * H_PRED:1 * H_PRED])
            f_g = jax.nn.sigmoid(gates[:, 1 * H_PRED:2 * H_PRED])
            g_g = jnp.tanh(gates[:, 2 * H_PRED:3 * H_PRED])
            o_g = jax.nn.sigmoid(gates[:, 3 * H_PRED:4 * H_PRED])
            c_l = f_g * c[l] + i_g * g_g
            h_l = o_g * jnp.tanh(c_l)
            h_new.append(h_l)
            c_new.append(c_l)
            x = h_l
        h = jnp.stack(h_new)
        c = jnp.stack(c_new)
        ys.append(x)
    dec_out = jnp.stack(ys, axis=1)                                    # (B, U1, H)

    enc = jnp.transpose(encoder_outputs, (0, 2, 1))                    # (B, T, D_enc)
    f = enc @ p['w_enc'] + p['b_enc']                                  # (B, T, Hj)
    g = dec_out @ p['w_pred'] + p['b_pred']                            # (B, U1, Hj)
    z = jax.nn.relu(f[:, :, None, :] + g[:, None, :, :])               # (B, T, U1, Hj)
    logits = z @ p['w_out'] + p['b_out']                               # (B, T, U1, NCLS)
    out = jax.nn.log_softmax(logits, axis=-1)
    return out, target_length, h, c


# ----------------------------- main ------------------------------------------
if __name__ == "__main__":
    key = jax.random.PRNGKey(0)
    keys = jax.random.split(key, 16)

    params = {
        'embedding': 0.1 * jax.random.normal(keys[0], (NCLS, H_PRED), jnp.float32),
        'w_xh':      0.1 * jax.random.normal(keys[1], (L, 2 * H_PRED, 4 * H_PRED), jnp.float32),
        'b_rnn':     0.1 * jax.random.normal(keys[2], (L, 1, 4 * H_PRED), jnp.float32),
        'w_enc':     0.1 * jax.random.normal(keys[3], (H_ENC, H_JOINT), jnp.float32),
        'b_enc':     0.1 * jax.random.normal(keys[4], (1, H_JOINT), jnp.float32),
        'w_pred':    0.1 * jax.random.normal(keys[5], (H_PRED, H_JOINT), jnp.float32),
        'b_pred':    0.1 * jax.random.normal(keys[6], (1, H_JOINT), jnp.float32),
        'w_out':     0.1 * jax.random.normal(keys[7], (H_JOINT, NCLS), jnp.float32),
        'b_out':     0.1 * jax.random.normal(keys[8], (1, NCLS), jnp.float32),
    }

    encoder_outputs = jax.random.normal(keys[9], (B, H_ENC, T_ENC), jnp.float32)
    targets = jax.random.randint(keys[10], (B, U), 0, VOCAB, dtype=jnp.int32)
    target_length = jnp.full((B,), U, dtype=jnp.int32)
    input_states_1 = 0.1 * jax.random.normal(keys[11], (L, B, H_PRED), jnp.float32)
    input_states_2 = 0.1 * jax.random.normal(keys[12], (L, B, H_PRED), jnp.float32)

    fwd = jax.jit(rnnt_decoder_joint_forward)
    out, lens, h_out, c_out = fwd(encoder_outputs, targets, target_length,
                                  input_states_1, input_states_2, params)
    jax.block_until_ready((out, lens, h_out, c_out))

    # correctness vs pure-f32 pure-JAX reference (kernel uses bf16 MXU operands)
    ref_out, ref_lens, ref_h, ref_c = reference_forward(
        encoder_outputs, targets, target_length,
        input_states_1, input_states_2, params)
    np.testing.assert_allclose(np.asarray(out), np.asarray(ref_out), rtol=2e-2, atol=2e-2)
    np.testing.assert_allclose(np.asarray(h_out), np.asarray(ref_h), rtol=2e-2, atol=2e-2)
    np.testing.assert_allclose(np.asarray(c_out), np.asarray(ref_c), rtol=2e-2, atol=2e-2)
    assert out.shape == (B, T_ENC, U1, NCLS)
    assert h_out.shape == (L, B, H_PRED) and c_out.shape == (L, B, H_PRED)
    np.testing.assert_array_equal(np.asarray(lens), np.asarray(target_length))

    print("KERNEL_OK")
</pallas_src>

<mosaic_0001>
module attributes {stable_mosaic.version = 11 : i64} {
  func.func @_fused_kernel(%arg0: memref<10x1xi32, #tpu.memory_space<vmem>>, %arg1: memref<16x32xbf16, #tpu.memory_space<vmem>>, %arg2: memref<2x2x32xf32, #tpu.memory_space<vmem>>, %arg3: memref<2x2x32xf32, #tpu.memory_space<vmem>>, %arg4: memref<16x128xbf16, #tpu.memory_space<vmem>>, %arg5: memref<32x128xbf16, #tpu.memory_space<vmem>>, %arg6: memref<32x128xbf16, #tpu.memory_space<vmem>>, %arg7: memref<32x128xbf16, #tpu.memory_space<vmem>>, %arg8: memref<1x128xf32, #tpu.memory_space<vmem>>, %arg9: memref<1x128xf32, #tpu.memory_space<vmem>>, %arg10: memref<32x32xbf16, #tpu.memory_space<vmem>>, %arg11: memref<1x32xf32, #tpu.memory_space<vmem>>, %arg12: memref<32x32xbf16, #tpu.memory_space<vmem>>, %arg13: memref<1x32xf32, #tpu.memory_space<vmem>>, %arg14: memref<32x16xbf16, #tpu.memory_space<vmem>>, %arg15: memref<1x16xf32, #tpu.memory_space<vmem>>, %arg16: memref<2x8x128xf32, #tpu.memory_space<vmem>>, %arg17: memref<2x128xf32, #tpu.memory_space<vmem>>) attributes {dimension_semantics = [], scalar_prefetch = 0 : i64, scratch_operands = 0 : i64, tpu.core_type = #tpu.core_type<tc>} {
    %c0 = arith.constant 0 : index
    %c0_0 = arith.constant 0 : index
    %0 = vector.load %arg0[%c0, %c0_0] : memref<10x1xi32, #tpu.memory_space<vmem>>, vector<10x1xi32>
    %1 = tpu.iota {dimensions = array<i32: 1>} : vector<10x16xi32>
    %2 = vector.broadcast %0 : vector<10x1xi32> to vector<10x16xi32>
    %3 = arith.cmpi eq, %1, %2 : vector<10x16xi32>
    %4 = arith.extui %3 : vector<10x16xi1> to vector<10x16xi32>
    %5 = arith.sitofp %4 : vector<10x16xi32> to vector<10x16xf32>
    %6 = arith.truncf %5 : vector<10x16xf32> to vector<10x16xbf16>
    %c0_1 = arith.constant 0 : index
    %c0_2 = arith.constant 0 : index
    %7 = vector.load %arg4[%c0_1, %c0_2] : memref<16x128xbf16, #tpu.memory_space<vmem>>, vector<16x128xbf16>
    %cst = arith.constant dense<0.000000e+00> : vector<10x128xf32>
    %8 = tpu.matmul %6, %7, %cst {dimension_numbers = #tpu.dot_dimension_numbers<[1], [0], [0], [1], [0, 0, 1, 1], [], []>} : vector<10x16xbf16>, vector<16x128xbf16>, vector<10x128xf32> -> vector<10x128xf32>
    %c0_3 = arith.constant 0 : index
    %c0_4 = arith.constant 0 : index
    %9 = vector.load %arg5[%c0_3, %c0_4] : memref<32x128xbf16, #tpu.memory_space<vmem>>, vector<32x128xbf16>
    %c0_5 = arith.constant 0 : index
    %c0_6 = arith.constant 0 : index
    %10 = vector.load %arg6[%c0_5, %c0_6] : memref<32x128xbf16, #tpu.memory_space<vmem>>, vector<32x128xbf16>
    %c0_7 = arith.constant 0 : index
    %c0_8 = arith.constant 0 : index
    %11 = vector.load %arg7[%c0_7, %c0_8] : memref<32x128xbf16, #tpu.memory_space<vmem>>, vector<32x128xbf16>
    %c0_9 = arith.constant 0 : index
    %c0_10 = arith.constant 0 : index
    %12 = vector.load %arg8[%c0_9, %c0_10] : memref<1x128xf32, #tpu.memory_space<vmem>>, vector<1x128xf32>
    %c0_11 = arith.constant 0 : index
    %c0_12 = arith.constant 0 : index
    %13 = vector.load %arg9[%c0_11, %c0_12] : memref<1x128xf32, #tpu.memory_space<vmem>>, vector<1x128xf32>
    %c0_13 = arith.constant 0 : index
    %c0_14 = arith.constant 0 : index
    %c0_15 = arith.constant 0 : index
    %14 = vector.load %arg2[%c0_13, %c0_14, %c0_15] : memref<2x2x32xf32, #tpu.memory_space<vmem>>, vector<1x2x32xf32>
    %15 = vector.shape_cast %14 : vector<1x2x32xf32> to vector<2x32xf32>
    %c1 = arith.constant 1 : index
    %c0_16 = arith.constant 0 : index
    %c0_17 = arith.constant 0 : index
    %16 = vector.load %arg2[%c1, %c0_16, %c0_17] : memref<2x2x32xf32, #tpu.memory_space<vmem>>, vector<1x2x32xf32>
    %17 = vector.shape_cast %16 : vector<1x2x32xf32> to vector<2x32xf32>
    %c0_18 = arith.constant 0 : index
    %c0_19 = arith.constant 0 : index
    %c0_20 = arith.constant 0 : index
    %18 = vector.load %arg3[%c0_18, %c0_19, %c0_20] : memref<2x2x32xf32, #tpu.memory_space<vmem>>, vector<1x2x32xf32>
    %19 = vector.shape_cast %18 : vector<1x2x32xf32> to vector<2x32xf32>
    %c1_21 = arith.constant 1 : index
    %c0_22 = arith.constant 0 : index
    %c0_23 = arith.constant 0 : index
    %20 = vector.load %arg3[%c1_21, %c0_22, %c0_23] : memref<2x2x32xf32, #tpu.memory_space<vmem>>, vector<1x2x32xf32>
    %21 = vector.shape_cast %20 : vector<1x2x32xf32> to vector<2x32xf32>
    %22 = vector.extract_strided_slice %8 {offsets = [0, 0], sizes = [2, 128], strides = [1, 1]} : vector<10x128xf32> to vector<2x128xf32>
    %23 = arith.truncf %15 : vector<2x32xf32> to vector<2x32xbf16>
    %cst_24 = arith.constant dense<0.000000e+00> : vector<2x128xf32>
    %24 = tpu.matmul %23, %9, %cst_24 {dimension_numbers = #tpu.dot_dimension_numbers<[1], [0], [0], [1], [0, 0, 1, 1], [], []>} : vector<2x32xbf16>, vector<32x128xbf16>, vector<2x128xf32> -> vector<2x128xf32>
    %25 = arith.addf %22, %24 : vector<2x128xf32>
    %26 = vector.broadcast %12 : vector<1x128xf32> to vector<2x128xf32>
    %27 = arith.addf %25, %26 : vector<2x128xf32>
    %28 = arith.negf %27 : vector<2x128xf32>
    %29 = math.exp %28 : vector<2x128xf32>
    %cst_25 = arith.constant 1.000000e+00 : f32
    %30 = vector.broadcast %cst_25 : f32 to vector<2x128xf32>
    %31 = arith.addf %30, %29 : vector<2x128xf32>
    %32 = arith.divf %30, %31 : vector<2x128xf32>
    %33 = vector.extract_strided_slice %32 {offsets = [0, 0], sizes = [2, 32], strides = [1, 1]} : vector<2x128xf32> to vector<2x32xf32>
    %34 = vector.extract_strided_slice %32 {offsets = [0, 32], sizes = [2, 32], strides = [1, 1]} : vector<2x128xf32> to vector<2x32xf32>
    %35 = vector.extract_strided_slice %32 {offsets = [0, 96], sizes = [2, 32], strides = [1, 1]} : vector<2x128xf32> to vector<2x32xf32>
    %36 = vector.extract_strided_slice %27 {offsets = [0, 64], sizes = [2, 32], strides = [1, 1]} : vector<2x128xf32> to vector<2x32xf32>
    %37 = math.tanh %36 : vector<2x32xf32>
    %38 = arith.mulf %34, %19 : vector<2x32xf32>
    %39 = arith.mulf %33, %37 : vector<2x32xf32>
    %40 = arith.addf %38, %39 : vector<2x32xf32>
    %41 = math.tanh %40 : vector<2x32xf32>
    %42 = arith.mulf %35, %41 : vector<2x32xf32>
    %43 = arith.truncf %42 : vector<2x32xf32> to vector<2x32xbf16>
    %cst_26 = arith.constant dense<0.000000e+00> : vector<2x128xf32>
    %44 = tpu.matmul %43, %10, %cst_26 {dimension_numbers = #tpu.dot_dimension_numbers<[1], [0], [0], [1], [0, 0, 1, 1], [], []>} : vector<2x32xbf16>, vector<32x128xbf16>, vector<2x128xf32> -> vector<2x128xf32>
    %45 = arith.truncf %17 : vector<2x32xf32> to vector<2x32xbf16>
    %cst_27 = arith.constant dense<0.000000e+00> : vector<2x128xf32>
    %46 = tpu.matmul %45, %11, %cst_27 {dimension_numbers = #tpu.dot_dimension_numbers<[1], [0], [0], [1], [0, 0, 1, 1], [], []>} : vector<2x32xbf16>, vector<32x128xbf16>, vector<2x128xf32> -> vector<2x128xf32>
    %47 = arith.addf %44, %46 : vector<2x128xf32>
    %48 = vector.broadcast %13 : vector<1x128xf32> to vector<2x128xf32>
    %49 = arith.addf %47, %48 : vector<2x128xf32>
    %50 = arith.negf %49 : vector<2x128xf32>
    %51 = math.exp %50 : vector<2x128xf32>
    %cst_28 = arith.constant 1.000000e+00 : f32
    %52 = vector.broadcast %cst_28 : f32 to vector<2x128xf32>
    %53 = arith.addf %52, %51 : vector<2x128xf32>
    %54 = arith.divf %52, %53 : vector<2x128xf32>
    %55 = vector.extract_strided_slice %54 {offsets = [0, 0], sizes = [2, 32], strides = [1, 1]} : vector<2x128xf32> to vector<2x32xf32>
    %56 = vector.extract_strided_slice %54 {offsets = [0, 32], sizes = [2, 32], strides = [1, 1]} : vector<2x128xf32> to vector<2x32xf32>
    %57 = vector.extract_strided_slice %54 {offsets = [0, 96], sizes = [2, 32], strides = [1, 1]} : vector<2x128xf32> to vector<2x32xf32>
    %58 = vector.extract_strided_slice %49 {offsets = [0, 64], sizes = [2, 32], strides = [1, 1]} : vector<2x128xf32> to vector<2x32xf32>
    %59 = math.tanh %58 : vector<2x32xf32>
    %60 = arith.mulf %56, %21 : vector<2x32xf32>
    %61 = arith.mulf %55, %59 : vector<2x32xf32>
    %62 = arith.addf %60, %61 : vector<2x32xf32>
    %63 = math.tanh %62 : vector<2x32xf32>
    %64 = arith.mulf %57, %63 : vector<2x32xf32>
    %65 = vector.extract_strided_slice %8 {offsets = [2, 0], sizes = [2, 128], strides = [1, 1]} : vector<10x128xf32> to vector<2x128xf32>
    %66 = arith.truncf %42 : vector<2x32xf32> to vector<2x32xbf16>
    %cst_29 = arith.constant dense<0.000000e+00> : vector<2x128xf32>
    %67 = tpu.matmul %66, %9, %cst_29 {dimension_numbers = #tpu.dot_dimension_numbers<[1], [0], [0], [1], [0, 0, 1, 1], [], []>} : vector<2x32xbf16>, vector<32x128xbf16>, vector<2x128xf32> -> vector<2x128xf32>
    %68 = arith.addf %65, %67 : vector<2x128xf32>
    %69 = vector.broadcast %12 : vector<1x128xf32> to vector<2x128xf32>
    %70 = arith.addf %68, %69 : vector<2x128xf32>
    %71 = arith.negf %70 : vector<2x128xf32>
    %72 = math.exp %71 : vector<2x128xf32>
    %cst_30 = arith.constant 1.000000e+00 : f32
    %73 = vector.broadcast %cst_30 : f32 to vector<2x128xf32>
    %74 = arith.addf %73, %72 : vector<2x128xf32>
    %75 = arith.divf %73, %74 : vector<2x128xf32>
    %76 = vector.extract_strided_slice %75 {offsets = [0, 0], sizes = [2, 32], strides = [1, 1]} : vector<2x128xf32> to vector<2x32xf32>
    %77 = vector.extract_strided_slice %75 {offsets = [0, 32], sizes = [2, 32], strides = [1, 1]} : vector<2x128xf32> to vector<2x32xf32>
    %78 = vector.extract_strided_slice %75 {offsets = [0, 96], sizes = [2, 32], strides = [1, 1]} : vector<2x128xf32> to vector<2x32xf32>
    %79 = vector.extract_strided_slice %70 {offsets = [0, 64], sizes = [2, 32], strides = [1, 1]} : vector<2x128xf32> to vector<2x32xf32>
    %80 = math.tanh %79 : vector<2x32xf32>
    %81 = arith.mulf %77, %40 : vector<2x32xf32>
    %82 = arith.mulf %76, %80 : vector<2x32xf32>
    %83 = arith.addf %81, %82 : vector<2x32xf32>
    %84 = math.tanh %83 : vector<2x32xf32>
    %85 = arith.mulf %78, %84 : vector<2x32xf32>
    %86 = arith.truncf %85 : vector<2x32xf32> to vector<2x32xbf16>
    %cst_31 = arith.constant dense<0.000000e+00> : vector<2x128xf32>
    %87 = tpu.matmul %86, %10, %cst_31 {dimension_numbers = #tpu.dot_dimension_numbers<[1], [0], [0], [1], [0, 0, 1, 1], [], []>} : vector<2x32xbf16>, vector<32x128xbf16>, vector<2x128xf32> -> vector<2x128xf32>
    %88 = arith.truncf %64 : vector<2x32xf32> to vector<2x32xbf16>
    %cst_32 = arith.constant dense<0.000000e+00> : vector<2x128xf32>
    %89 = tpu.matmul %88, %11, %cst_32 {dimension_numbers = #tpu.dot_dimension_numbers<[1], [0], [0], [1], [0, 0, 1, 1], [], []>} : vector<2x32xbf16>, vector<32x128xbf16>, vector<2x128xf32> -> vector<2x128xf32>
    %90 = arith.addf %87, %89 : vector<2x128xf32>
    %91 = vector.broadcast %13 : vector<1x128xf32> to vector<2x128xf32>
    %92 = arith.addf %90, %91 : vector<2x128xf32>
    %93 = arith.negf %92 : vector<2x128xf32>
    %94 = math.exp %93 : vector<2x128xf32>
    %cst_33 = arith.constant 1.000000e+00 : f32
    %95 = vector.broadcast %cst_33 : f32 to vector<2x128xf32>
    %96 = arith.addf %95, %94 : vector<2x128xf32>
    %97 = arith.divf %95, %96 : vector<2x128xf32>
    %98 = vector.extract_strided_slice %97 {offsets = [0, 0], sizes = [2, 32], strides = [1, 1]} : vector<2x128xf32> to vector<2x32xf32>
    %99 = vector.extract_strided_slice %97 {offsets = [0, 32], sizes = [2, 32], strides = [1, 1]} : vector<2x128xf32> to vector<2x32xf32>
    %100 = vector.extract_strided_slice %97 {offsets = [0, 96], sizes = [2, 32], strides = [1, 1]} : vector<2x128xf32> to vector<2x32xf32>
    %101 = vector.extract_strided_slice %92 {offsets = [0, 64], sizes = [2, 32], strides = [1, 1]} : vector<2x128xf32> to vector<2x32xf32>
    %102 = math.tanh %101 : vector<2x32xf32>
    %103 = arith.mulf %99, %62 : vector<2x32xf32>
    %104 = arith.mulf %98, %102 : vector<2x32xf32>
    %105 = arith.addf %103, %104 : vector<2x32xf32>
    %106 = math.tanh %105 : vector<2x32xf32>
    %107 = arith.mulf %100, %106 : vector<2x32xf32>
    %108 = vector.extract_strided_slice %8 {offsets = [4, 0], sizes = [2, 128], strides = [1, 1]} : vector<10x128xf32> to vector<2x128xf32>
    %109 = arith.truncf %85 : vector<2x32xf32> to vector<2x32xbf16>
    %cst_34 = arith.constant dense<0.000000e+00> : vector<2x128xf32>
    %110 = tpu.matmul %109, %9, %cst_34 {dimension_numbers = #tpu.dot_dimension_numbers<[1], [0], [0], [1], [0, 0, 1, 1], [], []>} : vector<2x32xbf16>, vector<32x128xbf16>, vector<2x128xf32> -> vector<2x128xf32>
    %111 = arith.addf %108, %110 : vector<2x128xf32>
    %112 = vector.broadcast %12 : vector<1x128xf32> to vector<2x128xf32>
    %113 = arith.addf %111, %112 : vector<2x128xf32>
    %114 = arith.negf %113 : vector<2x128xf32>
    %115 = math.exp %114 : vector<2x128xf32>
    %cst_35 = arith.constant 1.000000e+00 : f32
    %116 = vector.broadcast %cst_35 : f32 to vector<2x128xf32>
    %117 = arith.addf %116, %115 : vector<2x128xf32>
    %118 = arith.divf %116, %117 : vector<2x128xf32>
    %119 = vector.extract_strided_slice %118 {offsets = [0, 0], sizes = [2, 32], strides = [1, 1]} : vector<2x128xf32> to vector<2x32xf32>
    %120 = vector.extract_strided_slice %118 {offsets = [0, 32], sizes = [2, 32], strides = [1, 1]} : vector<2x128xf32> to vector<2x32xf32>
    %121 = vector.extract_strided_slice %118 {offsets = [0, 96], sizes = [2, 32], strides = [1, 1]} : vector<2x128xf32> to vector<2x32xf32>
    %122 = vector.extract_strided_slice %113 {offsets = [0, 64], sizes = [2, 32], strides = [1, 1]} : vector<2x128xf32> to vector<2x32xf32>
    %123 = math.tanh %122 : vector<2x32xf32>
    %124 = arith.mulf %120, %83 : vector<2x32xf32>
    %125 = arith.mulf %119, %123 : vector<2x32xf32>
    %126 = arith.addf %124, %125 : vector<2x32xf32>
    %127 = math.tanh %126 : vector<2x32xf32>
    %128 = arith.mulf %121, %127 : vector<2x32xf32>
    %129 = arith.truncf %128 : vector<2x32xf32> to vector<2x32xbf16>
    %cst_36 = arith.constant dense<0.000000e+00> : vector<2x128xf32>
    %130 = tpu.matmul %129, %10, %cst_36 {dimension_numbers = #tpu.dot_dimension_numbers<[1], [0], [0], [1], [0, 0, 1, 1], [], []>} : vector<2x32xbf16>, vector<32x128xbf16>, vector<2x128xf32> -> vector<2x128xf32>
    %131 = arith.truncf %107 : vector<2x32xf32> to vector<2x32xbf16>
    %cst_37 = arith.constant dense<0.000000e+00> : vector<2x128xf32>
    %132 = tpu.matmul %131, %11, %cst_37 {dimension_numbers = #tpu.dot_dimension_numbers<[1], [0], [0], [1], [0, 0, 1, 1], [], []>} : vector<2x32xbf16>, vector<32x128xbf16>, vector<2x128xf32> -> vector<2x128xf32>
    %133 = arith.addf %130, %132 : vector<2x128xf32>
    %134 = vector.broadcast %13 : vector<1x128xf32> to vector<2x128xf32>
    %135 = arith.addf %133, %134 : vector<2x128xf32>
    %136 = arith.negf %135 : vector<2x128xf32>
    %137 = math.exp %136 : vector<2x128xf32>
    %cst_38 = arith.constant 1.000000e+00 : f32
    %138 = vector.broadcast %cst_38 : f32 to vector<2x128xf32>
    %139 = arith.addf %138, %137 : vector<2x128xf32>
    %140 = arith.divf %138, %139 : vector<2x128xf32>
    %141 = vector.extract_strided_slice %140 {offsets = [0, 0], sizes = [2, 32], strides = [1, 1]} : vector<2x128xf32> to vector<2x32xf32>
    %142 = vector.extract_strided_slice %140 {offsets = [0, 32], sizes = [2, 32], strides = [1, 1]} : vector<2x128xf32> to vector<2x32xf32>
    %143 = vector.extract_strided_slice %140 {offsets = [0, 96], sizes = [2, 32], strides = [1, 1]} : vector<2x128xf32> to vector<2x32xf32>
    %144 = vector.extract_strided_slice %135 {offsets = [0, 64], sizes = [2, 32], strides = [1, 1]} : vector<2x128xf32> to vector<2x32xf32>
    %145 = math.tanh %144 : vector<2x32xf32>
    %146 = arith.mulf %142, %105 : vector<2x32xf32>
    %147 = arith.mulf %141, %145 : vector<2x32xf32>
    %148 = arith.addf %146, %147 : vector<2x32xf32>
    %149 = math.tanh %148 : vector<2x32xf32>
    %150 = arith.mulf %143, %149 : vector<2x32xf32>
    %151 = vector.extract_strided_slice %8 {offsets = [6, 0], sizes = [2, 128], strides = [1, 1]} : vector<10x128xf32> to vector<2x128xf32>
    %152 = arith.truncf %128 : vector<2x32xf32> to vector<2x32xbf16>
    %cst_39 = arith.constant dense<0.000000e+00> : vector<2x128xf32>
    %153 = tpu.matmul %152, %9, %cst_39 {dimension_numbers = #tpu.dot_dimension_numbers<[1], [0], [0], [1], [0, 0, 1, 1], [], []>} : vector<2x32xbf16>, vector<32x128xbf16>, vector<2x128xf32> -> vector<2x128xf32>
    %154 = arith.addf %151, %153 : vector<2x128xf32>
    %155 = vector.broadcast %12 : vector<1x128xf32> to vector<2x128xf32>
    %156 = arith.addf %154, %155 : vector<2x128xf32>
    %157 = arith.negf %156 : vector<2x128xf32>
    %158 = math.exp %157 : vector<2x128xf32>
    %cst_40 = arith.constant 1.000000e+00 : f32
    %159 = vector.broadcast %cst_40 : f32 to vector<2x128xf32>
    %160 = arith.addf %159, %158 : vector<2x128xf32>
    %161 = arith.divf %159, %160 : vector<2x128xf32>
    %162 = vector.extract_strided_slice %161 {offsets = [0, 0], sizes = [2, 32], strides = [1, 1]} : vector<2x128xf32> to vector<2x32xf32>
    %163 = vector.extract_strided_slice %161 {offsets = [0, 32], sizes = [2, 32], strides = [1, 1]} : vector<2x128xf32> to vector<2x32xf32>
    %164 = vector.extract_strided_slice %161 {offsets = [0, 96], sizes = [2, 32], strides = [1, 1]} : vector<2x128xf32> to vector<2x32xf32>
    %165 = vector.extract_strided_slice %156 {offsets = [0, 64], sizes = [2, 32], strides = [1, 1]} : vector<2x128xf32> to vector<2x32xf32>
    %166 = math.tanh %165 : vector<2x32xf32>
    %167 = arith.mulf %163, %126 : vector<2x32xf32>
    %168 = arith.mulf %162, %166 : vector<2x32xf32>
    %169 = arith.addf %167, %168 : vector<2x32xf32>
    %170 = math.tanh %169 : vector<2x32xf32>
    %171 = arith.mulf %164, %170 : vector<2x32xf32>
    %172 = arith.truncf %171 : vector<2x32xf32> to vector<2x32xbf16>
    %cst_41 = arith.constant dense<0.000000e+00> : vector<2x128xf32>
    %173 = tpu.matmul %172, %10, %cst_41 {dimension_numbers = #tpu.dot_dimension_numbers<[1], [0], [0], [1], [0, 0, 1, 1], [], []>} : vector<2x32xbf16>, vector<32x128xbf16>, vector<2x128xf32> -> vector<2x128xf32>
    %174 = arith.truncf %150 : vector<2x32xf32> to vector<2x32xbf16>
    %cst_42 = arith.constant dense<0.000000e+00> : vector<2x128xf32>
    %175 = tpu.matmul %174, %11, %cst_42 {dimension_numbers = #tpu.dot_dimension_numbers<[1], [0], [0], [1], [0, 0, 1, 1], [], []>} : vector<2x32xbf16>, vector<32x128xbf16>, vector<2x128xf32> -> vector<2x128xf32>
    %176 = arith.addf %173, %175 : vector<2x128xf32>
    %177 = vector.broadcast %13 : vector<1x128xf32> to vector<2x128xf32>
    %178 = arith.addf %176, %177 : vector<2x128xf32>
    %179 = arith.negf %178 : vector<2x128xf32>
    %180 = math.exp %179 : vector<2x128xf32>
    %cst_43 = arith.constant 1.000000e+00 : f32
    %181 = vector.broadcast %cst_43 : f32 to vector<2x128xf32>
    %182 = arith.addf %181, %180 : vector<2x128xf32>
    %183 = arith.divf %181, %182 : vector<2x128xf32>
    %184 = vector.extract_strided_slice %183 {offsets = [0, 0], sizes = [2, 32], strides = [1, 1]} : vector<2x128xf32> to vector<2x32xf32>
    %185 = vector.extract_strided_slice %183 {offsets = [0, 32], sizes = [2, 32], strides = [1, 1]} : vector<2x128xf32> to vector<2x32xf32>
    %186 = vector.extract_strided_slice %183 {offsets = [0, 96], sizes = [2, 32], strides = [1, 1]} : vector<2x128xf32> to vector<2x32xf32>
    %187 = vector.extract_strided_slice %178 {offsets = [0, 64], sizes = [2, 32], strides = [1, 1]} : vector<2x128xf32> to vector<2x32xf32>
    %188 = math.tanh %187 : vector<2x32xf32>
    %189 = arith.mulf %185, %148 : vector<2x32xf32>
    %190 = arith.mulf %184, %188 : vector<2x32xf32>
    %191 = arith.addf %189, %190 : vector<2x32xf32>
    %192 = math.tanh %191 : vector<2x32xf32>
    %193 = arith.mulf %186, %192 : vector<2x32xf32>
    %194 = vector.extract_strided_slice %8 {offsets = [8, 0], sizes = [2, 128], strides = [1, 1]} : vector<10x128xf32> to vector<2x128xf32>
    %195 = arith.truncf %171 : vector<2x32xf32> to vector<2x32xbf16>
    %cst_44 = arith.constant dense<0.000000e+00> : vector<2x128xf32>
    %196 = tpu.matmul %195, %9, %cst_44 {dimension_numbers = #tpu.dot_dimension_numbers<[1], [0], [0], [1], [0, 0, 1, 1], [], []>} : vector<2x32xbf16>, vector<32x128xbf16>, vector<2x128xf32> -> vector<2x128xf32>
    %197 = arith.addf %194, %196 : vector<2x128xf32>
    %198 = vector.broadcast %12 : vector<1x128xf32> to vector<2x128xf32>
    %199 = arith.addf %197, %198 : vector<2x128xf32>
    %200 = arith.negf %199 : vector<2x128xf32>
    %201 = math.exp %200 : vector<2x128xf32>
    %cst_45 = arith.constant 1.000000e+00 : f32
    %202 = vector.broadcast %cst_45 : f32 to vector<2x128xf32>
    %203 = arith.addf %202, %201 : vector<2x128xf32>
    %204 = arith.divf %202, %203 : vector<2x128xf32>
    %205 = vector.extract_strided_slice %204 {offsets = [0, 0], sizes = [2, 32], strides = [1, 1]} : vector<2x128xf32> to vector<2x32xf32>
    %206 = vector.extract_strided_slice %204 {offsets = [0, 32], sizes = [2, 32], strides = [1, 1]} : vector<2x128xf32> to vector<2x32xf32>
    %207 = vector.extract_strided_slice %204 {offsets = [0, 96], sizes = [2, 32], strides = [1, 1]} : vector<2x128xf32> to vector<2x32xf32>
    %208 = vector.extract_strided_slice %199 {offsets = [0, 64], sizes = [2, 32], strides = [1, 1]} : vector<2x128xf32> to vector<2x32xf32>
    %209 = math.tanh %208 : vector<2x32xf32>
    %210 = arith.mulf %206, %169 : vector<2x32xf32>
    %211 = arith.mulf %205, %209 : vector<2x32xf32>
    %212 = arith.addf %210, %211 : vector<2x32xf32>
    %213 = math.tanh %212 : vector<2x32xf32>
    %214 = arith.mulf %207, %213 : vector<2x32xf32>
    %215 = arith.truncf %214 : vector<2x32xf32> to vector<2x32xbf16>
    %cst_46 = arith.constant dense<0.000000e+00> : vector<2x128xf32>
    %216 = tpu.matmul %215, %10, %cst_46 {dimension_numbers = #tpu.dot_dimension_numbers<[1], [0], [0], [1], [0, 0, 1, 1], [], []>} : vector<2x32xbf16>, vector<32x128xbf16>, vector<2x128xf32> -> vector<2x128xf32>
    %217 = arith.truncf %193 : vector<2x32xf32> to vector<2x32xbf16>
    %cst_47 = arith.constant dense<0.000000e+00> : vector<2x128xf32>
    %218 = tpu.matmul %217, %11, %cst_47 {dimension_numbers = #tpu.dot_dimension_numbers<[1], [0], [0], [1], [0, 0, 1, 1], [], []>} : vector<2x32xbf16>, vector<32x128xbf16>, vector<2x128xf32> -> vector<2x128xf32>
    %219 = arith.addf %216, %218 : vector<2x128xf32>
    %220 = vector.broadcast %13 : vector<1x128xf32> to vector<2x128xf32>
    %221 = arith.addf %219, %220 : vector<2x128xf32>
    %222 = arith.negf %221 : vector<2x128xf32>
    %223 = math.exp %222 : vector<2x128xf32>
    %cst_48 = arith.constant 1.000000e+00 : f32
    %224 = vector.broadcast %cst_48 : f32 to vector<2x128xf32>
    %225 = arith.addf %224, %223 : vector<2x128xf32>
    %226 = arith.divf %224, %225 : vector<2x128xf32>
    %227 = vector.extract_strided_slice %226 {offsets = [0, 0], sizes = [2, 32], strides = [1, 1]} : vector<2x128xf32> to vector<2x32xf32>
    %228 = vector.extract_strided_slice %226 {offsets = [0, 32], sizes = [2, 32], strides = [1, 1]} : vector<2x128xf32> to vector<2x32xf32>
    %229 = vector.extract_strided_slice %226 {offsets = [0, 96], sizes = [2, 32], strides = [1, 1]} : vector<2x128xf32> to vector<2x32xf32>
    %230 = vector.extract_strided_slice %221 {offsets = [0, 64], sizes = [2, 32], strides = [1, 1]} : vector<2x128xf32> to vector<2x32xf32>
    %231 = math.tanh %230 : vector<2x32xf32>
    %232 = arith.mulf %228, %191 : vector<2x32xf32>
    %233 = arith.mulf %227, %231 : vector<2x32xf32>
    %234 = arith.addf %232, %233 : vector<2x32xf32>
    %235 = math.tanh %234 : vector<2x32xf32>
    %236 = arith.mulf %229, %235 : vector<2x32xf32>
    %237 = tpu.concatenate %214, %236, %212, %234 in 1 : vector<2x32xf32>, vector<2x32xf32>, vector<2x32xf32>, vector<2x32xf32> -> vector<2x128xf32>
    %c0_49 = arith.constant 0 : index
    %c0_50 = arith.constant 0 : index
    %238 = vector.load %arg17[%c0_49, %c0_50] : memref<2x128xf32, #tpu.memory_space<vmem>>, vector<2x128xf32>
    tpu.vector_store %arg17[%c0_49, %c0_50], %237 {strides = array<i32>} : memref<2x128xf32, #tpu.memory_space<vmem>>, vector<2x128xf32>,
    %c0_51 = arith.constant 0 : index
    %c0_52 = arith.constant 0 : index
    %239 = vector.load %arg1[%c0_51, %c0_52] : memref<16x32xbf16, #tpu.memory_space<vmem>>, vector<16x32xbf16>
    %c0_53 = arith.constant 0 : index
    %c0_54 = arith.constant 0 : index
    %240 = vector.load %arg10[%c0_53, %c0_54] : memref<32x32xbf16, #tpu.memory_space<vmem>>, vector<32x32xbf16>
    %cst_55 = arith.constant dense<0.000000e+00> : vector<16x32xf32>
    %241 = tpu.matmul %239, %240, %cst_55 {dimension_numbers = #tpu.dot_dimension_numbers<[1], [0], [0], [1], [0, 0, 1, 1], [], []>} : vector<16x32xbf16>, vector<32x32xbf16>, vector<16x32xf32> -> vector<16x32xf32>
    %c0_56 = arith.constant 0 : index
    %c0_57 = arith.constant 0 : index
    %242 = vector.load %arg11[%c0_56, %c0_57] : memref<1x32xf32, #tpu.memory_space<vmem>>, vector<1x32xf32>
    %243 = vector.broadcast %242 : vector<1x32xf32> to vector<16x32xf32>
    %244 = arith.addf %241, %243 : vector<16x32xf32>
    %245 = tpu.concatenate %64, %107, %150, %193, %236 in 0 : vector<2x32xf32>, vector<2x32xf32>, vector<2x32xf32>, vector<2x32xf32>, vector<2x32xf32> -> vector<10x32xf32>
    %246 = arith.truncf %245 : vector<10x32xf32> to vector<10x32xbf16>
    %c0_58 = arith.constant 0 : index
    %c0_59 = arith.constant 0 : index
    %247 = vector.load %arg12[%c0_58, %c0_59] : memref<32x32xbf16, #tpu.memory_space<vmem>>, vector<32x32xbf16>
    %cst_60 = arith.constant dense<0.000000e+00> : vector<10x32xf32>
    %248 = tpu.matmul %246, %247, %cst_60 {dimension_numbers = #tpu.dot_dimension_numbers<[1], [0], [0], [1], [0, 0, 1, 1], [], []>} : vector<10x32xbf16>, vector<32x32xbf16>, vector<10x32xf32> -> vector<10x32xf32>
    %c0_61 = arith.constant 0 : index
    %c0_62 = arith.constant 0 : index
    %249 = vector.load %arg13[%c0_61, %c0_62] : memref<1x32xf32, #tpu.memory_space<vmem>>, vector<1x32xf32>
    %250 = vector.broadcast %249 : vector<1x32xf32> to vector<10x32xf32>
    %251 = arith.addf %248, %250 : vector<10x32xf32>
    %252 = vector.shape_cast %244 : vector<16x32xf32> to vector<2x8x32xf32>
    %253 = vector.extract_strided_slice %251 {offsets = [0, 0], sizes = [2, 32], strides = [1, 1]} : vector<10x32xf32> to vector<2x32xf32>
    %254 = vector.shape_cast %253 : vector<2x32xf32> to vector<2x1x32xf32>
    %255 = vector.broadcast %254 : vector<2x1x32xf32> to vector<2x8x32xf32>
    %256 = arith.addf %252, %255 : vector<2x8x32xf32>
    %cst_63 = arith.constant 0.000000e+00 : f32
    %257 = vector.broadcast %cst_63 : f32 to vector<2x8x32xf32>
    %258 = arith.maximumf %256, %257 : vector<2x8x32xf32>
    %259 = vector.shape_cast %258 : vector<2x8x32xf32> to vector<16x32xf32>
    %260 = vector.extract_strided_slice %251 {offsets = [2, 0], sizes = [2, 32], strides = [1, 1]} : vector<10x32xf32> to vector<2x32xf32>
    %261 = vector.shape_cast %260 : vector<2x32xf32> to vector<2x1x32xf32>
    %262 = vector.broadcast %261 : vector<2x1x32xf32> to vector<2x8x32xf32>
    %263 = arith.addf %252, %262 : vector<2x8x32xf32>
    %cst_64 = arith.constant 0.000000e+00 : f32
    %264 = vector.broadcast %cst_64 : f32 to vector<2x8x32xf32>
    %265 = arith.maximumf %263, %264 : vector<2x8x32xf32>
    %266 = vector.shape_cast %265 : vector<2x8x32xf32> to vector<16x32xf32>
    %267 = vector.extract_strided_slice %251 {offsets = [4, 0], sizes = [2, 32], strides = [1, 1]} : vector<10x32xf32> to vector<2x32xf32>
    %268 = vector.shape_cast %267 : vector<2x32xf32> to vector<2x1x32xf32>
    %269 = vector.broadcast %268 : vector<2x1x32xf32> to vector<2x8x32xf32>
    %270 = arith.addf %252, %269 : vector<2x8x32xf32>
    %cst_65 = arith.constant 0.000000e+00 : f32
    %271 = vector.broadcast %cst_65 : f32 to vector<2x8x32xf32>
    %272 = arith.maximumf %270, %271 : vector<2x8x32xf32>
    %273 = vector.shape_cast %272 : vector<2x8x32xf32> to vector<16x32xf32>
    %274 = vector.extract_strided_slice %251 {offsets = [6, 0], sizes = [2, 32], strides = [1, 1]} : vector<10x32xf32> to vector<2x32xf32>
    %275 = vector.shape_cast %274 : vector<2x32xf32> to vector<2x1x32xf32>
    %276 = vector.broadcast %275 : vector<2x1x32xf32> to vector<2x8x32xf32>
    %277 = arith.addf %252, %276 : vector<2x8x32xf32>
    %cst_66 = arith.constant 0.000000e+00 : f32
    %278 = vector.broadcast %cst_66 : f32 to vector<2x8x32xf32>
    %279 = arith.maximumf %277, %278 : vector<2x8x32xf32>
    %280 = vector.shape_cast %279 : vector<2x8x32xf32> to vector<16x32xf32>
    %281 = vector.extract_strided_slice %251 {offsets = [8, 0], sizes = [2, 32], strides = [1, 1]} : vector<10x32xf32> to vector<2x32xf32>
    %282 = vector.shape_cast %281 : vector<2x32xf32> to vector<2x1x32xf32>
    %283 = vector.broadcast %282 : vector<2x1x32xf32> to vector<2x8x32xf32>
    %284 = arith.addf %252, %283 : vector<2x8x32xf32>
    %cst_67 = arith.constant 0.000000e+00 : f32
    %285 = vector.broadcast %cst_67 : f32 to vector<2x8x32xf32>
    %286 = arith.maximumf %284, %285 : vector<2x8x32xf32>
    %287 = vector.shape_cast %286 : vector<2x8x32xf32> to vector<16x32xf32>
    %288 = tpu.concatenate %259, %266, %273, %280, %287 in 0 : vector<16x32xf32>, vector<16x32xf32>, vector<16x32xf32>, vector<16x32xf32>, vector<16x32xf32> -> vector<80x32xf32>
    %289 = arith.truncf %288 : vector<80x32xf32> to vector<80x32xbf16>
    %c0_68 = arith.constant 0 : index
    %c0_69 = arith.constant 0 : index
    %290 = vector.load %arg14[%c0_68, %c0_69] : memref<32x16xbf16, #tpu.memory_space<vmem>>, vector<32x16xbf16>
    %cst_70 = arith.constant dense<0.000000e+00> : vector<80x16xf32>
    %291 = tpu.matmul %289, %290, %cst_70 {dimension_numbers = #tpu.dot_dimension_numbers<[1], [0], [0], [1], [0, 0, 1, 1], [], []>} : vector<80x32xbf16>, vector<32x16xbf16>, vector<80x16xf32> -> vector<80x16xf32>
    %c0_71 = arith.constant 0 : index
    %c0_72 = arith.constant 0 : index
    %292 = vector.load %arg15[%c0_71, %c0_72] : memref<1x16xf32, #tpu.memory_space<vmem>>, vector<1x16xf32>
    %293 = vector.broadcast %292 : vector<1x16xf32> to vector<80x16xf32>
    %294 = arith.addf %291, %293 : vector<80x16xf32>
    %cst_73 = arith.constant dense<0xFF800000> : vector<80xf32>
    %295 = vector.multi_reduction <maximumf>, %294, %cst_73 [1] : vector<80x16xf32> to vector<80xf32>
    %296 = vector.shape_cast %295 : vector<80xf32> to vector<80x1xf32>
    %297 = vector.broadcast %296 : vector<80x1xf32> to vector<80x16xf32>
    %298 = arith.subf %294, %297 : vector<80x16xf32>
    %299 = math.exp %298 : vector<80x16xf32>
    %cst_74 = arith.constant dense<0.000000e+00> : vector<80xf32>
    %300 = vector.multi_reduction <add>, %299, %cst_74 [1] : vector<80x16xf32> to vector<80xf32>
    %301 = vector.shape_cast %300 : vector<80xf32> to vector<80x1xf32>
    %302 = math.log %301 : vector<80x1xf32>
    %303 = vector.broadcast %302 : vector<80x1xf32> to vector<80x16xf32>
    %304 = arith.subf %298, %303 : vector<80x16xf32>
    %305 = vector.extract_strided_slice %304 {offsets = [0, 0], sizes = [16, 16], strides = [1, 1]} : vector<80x16xf32> to vector<16x16xf32>
    %306 = vector.extract_strided_slice %304 {offsets = [16, 0], sizes = [16, 16], strides = [1, 1]} : vector<80x16xf32> to vector<16x16xf32>
    %307 = vector.extract_strided_slice %304 {offsets = [32, 0], sizes = [16, 16], strides = [1, 1]} : vector<80x16xf32> to vector<16x16xf32>
    %308 = vector.extract_strided_slice %304 {offsets = [48, 0], sizes = [16, 16], strides = [1, 1]} : vector<80x16xf32> to vector<16x16xf32>
    %309 = vector.extract_strided_slice %304 {offsets = [64, 0], sizes = [16, 16], strides = [1, 1]} : vector<80x16xf32> to vector<16x16xf32>
    %cst_75 = arith.constant 0.000000e+00 : f32
    %310 = vector.broadcast %cst_75 : f32 to vector<16x48xf32>
    %311 = tpu.concatenate %305, %306, %307, %308, %309, %310 in 1 : vector<16x16xf32>, vector<16x16xf32>, vector<16x16xf32>, vector<16x16xf32>, vector<16x16xf32>, vector<16x48xf32> -> vector<16x128xf32>
    %312 = vector.shape_cast %311 : vector<16x128xf32> to vector<2x8x128xf32>
    %c0_76 = arith.constant 0 : index
    %c0_77 = arith.constant 0 : index
    %c0_78 = arith.constant 0 : index
    %313 = vector.load %arg16[%c0_76, %c0_77, %c0_78] : memref<2x8x128xf32, #tpu.memory_space<vmem>>, vector<2x8x128xf32>
    tpu.vector_store %arg16[%c0_76, %c0_77, %c0_78], %312 {strides = array<i32>} : memref<2x8x128xf32, #tpu.memory_space<vmem>>, vector<2x8x128xf32>,
    return
  }
}

</mosaic_0001>

<bundles_post_ra>
// kernel: rnnt_decoder_joint_forward.1
= control target key start
LH: loop header
LB: loop body
LE: loop exit
PB: predicated region body
PF: predicated region fallthrough
CT: control target
= control target key end

     0   :  { %v2197_v0 = vmov 0   ;;  %v2198_v2 = vmov 0.0   ;;  %vm2199_vm0 = vmmov 0   ;;  %vm159_vm1 = vcmask 261120   ;;  %s2200_s24 = smov 64   ;;  %s2201_s27 = smov 32   ;;  %s2733_s0 = inlined_call_operand.vmem [shape: s32[10,1], index: 0, kind: input, shape index: {}]   ;;  %s2734_s5 = inlined_call_operand.vmem [shape: bf16[32,128], index: 5, kind: input, shape index: {}]   ;;  %s2735_s2 = inlined_call_operand.vmem [shape: f32[2,2,32], index: 2, kind: input, shape index: {}]   ;;  %s2736_s4 = inlined_call_operand.vmem [shape: bf16[16,128], index: 4, kind: input, shape index: {}]   ;;  %s2737_s8 = inlined_call_operand.vmem [shape: f32[1,128], index: 8, kind: input, shape index: {}]   ;;  %s2738_s3 = inlined_call_operand.vmem [shape: f32[2,2,32], index: 3, kind: input, shape index: {}]   ;;  %s2739_s7 = inlined_call_operand.vmem [shape: bf16[32,128], index: 7, kind: input, shape index: {}]   ;;  %s2740_s6 = inlined_call_operand.vmem [shape: bf16[32,128], index: 6, kind: input, shape index: {}]   ;;  %s2741_s9 = inlined_call_operand.vmem [shape: f32[1,128], index: 9, kind: input, shape index: {}]   ;;  %s2742_s12 = inlined_call_operand.vmem [shape: bf16[32,32], index: 12, kind: input, shape index: {}]   ;;  %s2743_s10 = inlined_call_operand.vmem [shape: bf16[32,32], index: 10, kind: input, shape index: {}]   ;;  %s2744_s1 = inlined_call_operand.vmem [shape: bf16[16,32], index: 1, kind: input, shape index: {}]   ;;  %s2745_s14 = inlined_call_operand.vmem [shape: bf16[32,16], index: 14, kind: input, shape index: {}]   ;;  %s2746_s13 = inlined_call_operand.vmem [shape: f32[1,32], index: 13, kind: input, shape index: {}]   ;;  %s2747_s11 = inlined_call_operand.vmem [shape: f32[1,32], index: 11, kind: input, shape index: {}]   ;;  %s2748_s15 = inlined_call_operand.vmem [shape: f32[1,16], index: 15, kind: input, shape index: {}]   ;;  %s2749_s16 = inlined_call_operand.vmem [shape: f32[2,8,128], index: 16, kind: output, shape index: {0}]   ;;  %s2750_s17 = inlined_call_operand.vmem [shape: f32[2,128], index: 17, kind: output, shape index: {1}]  }
   0x1   :  { %2753 = sst [smem:[#allocation2_spill]] %s2733_s0  ;;  %2062 = vset.pattern.permute.xlu0 %v2197_v0  ;;  %1890 = vmatprep.subr.bf16.mxu1 %v2198_v2  ;;  %v140_v6 = vld [vmem:[%s2735_s2] sm:$0x3]  ;;  %v58_v9 = vlaneseq  ;;  %vm81_vm4 = vcmask 130048   ;;  %v1772_v39 = vld [vmem:[%s2735_s2 + $0x2] sm:$0x3] }
   0x2   :  { %2754 = sst [smem:[#allocation3_spill]] %s2734_s5  ;;  %s2755_s26 = sld [smem:[#allocation2_spill]]  ;;  %1884 = vmatprep.subr.bf16.mxu0 %v2198_v2  ;;  %v2065_v7 = vld [vmem:[%s2736_s4] sm:$0xff]   ;;  %1894 = vmatprep.mubr.msk.bf16.mxu1 %vm2199_vm0, %v2198_v2  ;;  %v146_v8 = vpack.c.bf16 %v140_v6, %v140_v6  ;;  %v2368_v41 = vld [vmem:[%s2739_s7 + $0x8] sm:$0xff]   ;;  %v240_v44 = vpack.c.bf16 %v1772_v39, %v1772_v39  ;;  %vm1258_vm5 = vcmask 1041408   ;;  %vm1260_vm6 = vcmask 1043456  }
   0x3   :  { %s2756_s29 = sld [smem:[#allocation3_spill]]  ;;  %1885 = vmatpush3.bf16.msra.mxu0 %v2065_v7  ;;  %1886 = vmatprep.mubr.msk.bf16.mxu0 %vm2199_vm0, %v2198_v2  ;;  %v59_v10 = vand.u32 127, %v58_v9  ;;  %v2342_v21 = vld [vmem:[%s2737_s8] ss:$0 sm:$0xff]  ;;  %v2381_v43 = vld [vmem:[%s2740_s6 + $0x8] sm:$0xff]   ;;  %vm1262_vm7 = vcmask 1045504  }
   0x4   :  { %1898 = vmatprep.subr.bf16.mxu0 %v2198_v2  ;;  %v143_v28 = vld [vmem:[%s2738_s3] sm:$0x3]  ;;  %s2204_s2 = smov 16   ;;  %vm1750_vm8 = vcmask 392192   ;;  %vm1755_vm9 = vcmask 654336   ;;  %vm1170_vm10 = vcmask 523264  }
   0x5   :  { %v2363_v40 = vld [vmem:[%s2739_s7] sm:$0xff]   ;;  %vm1172_vm11 = vcmask 785408  }
   0x6   :  { %v2374_v42 = vld [vmem:[%s2740_s6] sm:$0xff]  }
   0x7   :  { %v2414_v54 = vld [vmem:[%s2741_s9] ss:$0 sm:$0xff] }
   0x8   :  { %v56_v1 = vld [vmem:[%s2755_s26] sm:$0xff]  ;;  %v57_v4 = vld [vmem:[%s2755_s26 + $0x8] sm:$0x3] }
   0x9   :  { %61 = vperm.xlu0 %2062, %v56_v1   ;;  %v2302_v3 = vld [vmem:[%s2756_s29] sm:$0xff]   ;;  %v2312_v5 = vld [vmem:[%s2756_s29 + $0x8] sm:$0xff]  }
   0xa   :  { %1891 = vmatpush3.bf16.msra.mxu1 %v2302_v3 }
   0xb   :  { %1892 = vmatprep.subr.bf16.mxu1 %v2198_v2 }
   0xd   :  { %64 = vperm.xlu0 %2062, %v57_v4  }
   0xe   :  { %1893 = vmatpush3.bf16.msra.mxu1 %v2312_v5 }
   0xf   :  { %1906 = vmatprep.subr.bf16.mxu1 %v2198_v2 }
  0x11   :  { %1895 = vmatmul.mubr.msk.bf16.vlgmr.msra.gmra.mrb[0].mxu1 %vm159_vm1, %v146_v8  ;;  %v1773_v8 = vld [vmem:[%s2738_s3 + $0x2] sm:$0x3] }
  0x12   :  { %1910 = vmatprep.mubr.msk.bf16.mxu1 %vm2199_vm0, %v2198_v2  ;;  %1907 = vmatpush3.bf16.msra.mxu1 %v2374_v42 }
  0x13   :  { %1908 = vmatprep.subr.bf16.mxu1 %v2198_v2 }
  0x16   :  { %1909 = vmatpush3.bf16.msra.mxu1 %v2381_v43 }
  0x17   :  { %1922 = vmatprep.subr.bf16.mxu1 %v2198_v2 }
  0x88   :  { %v62_v11 = vpop.permute.xlu0 %61 }
  0x89   :  { %vm66_vm2 = vcmp.eq.s32.totalorder %v59_v10, %v62_v11 }
  0x8a   :  { %v1768_v13 = vsel %vm66_vm2, 1.0, %v2198_v2 }
  0x8c   :  { %v65_v12 = vpop.permute.xlu0 %64 }
  0x8d   :  { %vm67_vm3 = vcmp.eq.s32.totalorder %v59_v10, %v65_v12 }
  0x8e   :  { %v1769_v14 = vsel %vm67_vm3, 1.0, %v2198_v2 }
  0x8f   :  { %v72_v15 = vpack.c.bf16 %v1769_v14, %v1768_v13 }
  0x91   :  { %1887 = vmatmul.mubr.msk.bf16.vlgmr.msra.gmra.mrb[0].mxu0 %vm81_vm4, %v72_v15 }
  0x92   :  { %1902 = vmatprep.mubr.msk.bf16.mxu0 %vm2199_vm0, %v2198_v2  ;;  %1899 = vmatpush3.bf16.msra.mxu0 %v2363_v40 }
  0x93   :  { %1900 = vmatprep.subr.bf16.mxu0 %v2198_v2 }
  0x96   :  { %1901 = vmatpush3.bf16.msra.mxu0 %v2368_v41 }
  0x97   :  { %1914 = vmatprep.subr.bf16.mxu0 %v2198_v2 }
  0x99   :  { %1903 = vmatmul.mubr.msk.bf16.vlgmr.msra.gmra.mrb[4].mxu0 %vm159_vm1, %v240_v44 }
  0x9a   :  { %1915 = vmatpush3.bf16.msra.mxu0 %v2302_v3  ;;  %1918 = vmatprep.mubr.msk.bf16.mxu0 %vm2199_vm0, %v2198_v2 }
  0x9b   :  { %1916 = vmatprep.subr.bf16.mxu0 %v2198_v2 }
  0x9e   :  { %1917 = vmatpush3.bf16.msra.mxu0 %v2312_v5 }
  0x9f   :  { %1930 = vmatprep.subr.bf16.mxu0 %v2198_v2 }
  0xe4   :  { %v197_v16 = vpop.f32.mrb[0].mxu1 }
  0xe5   :  { %v1896_v17 = vpop.f32.mrb[1].mxu1 }
  0xe6   :  { %v200_v18 = vpop.f32.mrb[2].mxu1 }
  0xe7   :  { %v1897_v19 = vpop.f32.mrb[3].mxu1 }
 0x164   :  { %v2337_v20 = vpop.f32.mrb[0].mxu0 }
 0x165   :  { %v203_v22 = vadd.f32 %v197_v16, %v2337_v20  ;;  %v1888_v23 = vpop.f32.mrb[1].mxu0 }
 0x166   :  { %v2345_v24 = vpop.f32.mrb[2].mxu0 }
 0x167   :  { %v210_v25 = vadd.f32 %v2342_v21, %v203_v22  ;;  %v1889_v26 = vpop.f32.mrb[3].mxu0 }
 0x169   :  { %2077 = vtanh.f32 %v210_v25  ;;  %v1778_v29 = vmul.f32 -1.442695, %v210_v25 }
 0x16b   :  { %2079 = vpow2.f32 %v1778_v29 }
 0x16c   :  { %v290_v49 = vpop.f32.mrb[4].mxu0 }
 0x16d   :  { %v1904_v50 = vpop.f32.mrb[5].mxu0 }
 0x16e   :  { %v293_v51 = vpop.f32.mrb[6].mxu0 }
 0x16f   :  { %v1905_v52 = vpop.f32.mrb[7].mxu0 }
 0x173   :  { %v2078_v27 = vpop.eup %2077 }
 0x174   :  { %224 = vrot.lane.b32.xlu1 %v2078_v27, %s2200_s24 }
 0x175   :  { %v2080_v30 = vpop.eup %2079 }
 0x176   :  { %v214_v31 = vadd.f32 1.0, %v2080_v30 }
 0x178   :  { %219 = vrot.lane.b32.xlu1 %v143_v28, %s2201_s27  ;;  %2081 = vrcp.f32 %v214_v31 }
 0x182   :  { %v2082_v32 = vpop.eup %2081 }
 0x1e6   :  { %v225_v33 = vpop.permute.xlu1 %224 }
 0x1e7   :  { %v227_v34 = vmul.f32 %v2082_v32, %v225_v33 }
 0x1e9   :  { %229 = vrot.lane.b32.xlu0 %v227_v34, %s2201_s27 }
 0x1ea   :  { %v220_v35 = vpop.permute.xlu1 %219 }
 0x1eb   :  { %v222_v36 = vmul.f32 %v2082_v32, %v220_v35 }
 0x25b   :  { %v230_v37 = vpop.permute.xlu0 %229 }
 0x25c   :  { %v2354_v38 = vadd.f32 %v230_v37, %v222_v36 }
 0x25e   :  { %2083 = vtanh.f32 %v2354_v38  ;;  %v442_v28 = vrot.slane %v2354_v38, 6 }
 0x268   :  { %v2084_v45 = vpop.eup %2083 }
 0x269   :  { %235 = vrot.lane.b32.xlu1 %v2084_v45, %s2200_s24 }
 0x2db   :  { %v236_v46 = vpop.permute.xlu1 %235 }
 0x2dc   :  { %v238_v47 = vmul.f32 %v2082_v32, %v236_v46 }
 0x2de   :  { %v239_v48 = vpack.c.bf16 %v238_v47, %v238_v47 }
 0x2e0   :  { %297 = vrot.lane.b32.xlu0 %v239_v48, %s2201_s27 }
 0x352   :  { %v298_v53 = vpop.permute.xlu0 %297 }
 0x353   :  { %1911 = vmatmul.mubr.msk.bf16.vlgmr.msra.gmra.mrb[4].mxu1 %vm159_vm1, %v298_v53  ;;  %1919 = vmatmul.mubr.msk.bf16.vlgmr.msra.gmra.mrb[8].mxu0 %vm159_vm1, %v298_v53 }
 0x354   :  { %1923 = vmatpush3.bf16.msra.mxu1 %v2363_v40  ;;  %1931 = vmatpush3.bf16.msra.mxu0 %v2374_v42 }
 0x355   :  { %1924 = vmatprep.subr.bf16.mxu1 %v2198_v2  ;;  %1926 = vmatprep.mubr.msk.bf16.mxu1 %vm2199_vm0, %v2198_v2 }
 0x356   :  { %1932 = vmatprep.subr.bf16.mxu0 %v2198_v2  ;;  %1934 = vmatprep.mubr.msk.bf16.mxu0 %vm2199_vm0, %v2198_v2 }
 0x358   :  { %1925 = vmatpush3.bf16.msra.mxu1 %v2368_v41  ;;  %1933 = vmatpush3.bf16.msra.mxu0 %v2381_v43 }
 0x359   :  { %1938 = vmatprep.subr.bf16.mxu1 %v2198_v2  ;;  %1946 = vmatprep.subr.bf16.mxu0 %v2198_v2 }
 0x426   :  { %v348_v55 = vpop.f32.mrb[4].mxu1  ;;  %v423_v56 = vpop.f32.mrb[8].mxu0 }
 0x427   :  { %v349_v57 = vadd.f32 %v348_v55, %v290_v49  ;;  %v430_v58 = vrot.slane %v423_v56, 6  ;;  %v1912_v59 = vpop.f32.mrb[5].mxu1  ;;  %v1920_v60 = vpop.f32.mrb[9].mxu0 }
 0x428   :  { %v351_v61 = vpop.f32.mrb[6].mxu1  ;;  %v426_v62 = vpop.f32.mrb[10].mxu0 }
 0x429   :  { %v360_v63 = vadd.f32 %v2414_v54, %v349_v57  ;;  %v432_v0 = vadd.f32 %v430_v58, %v2337_v20  ;;  %v1913_v1 = vpop.f32.mrb[7].mxu1  ;;  %v1921_v4 = vpop.f32.mrb[11].mxu0 }
 0x42b   :  { %2085 = vtanh.f32 %v360_v63  ;;  %v433_v6 = vadd.f32 %v2342_v21, %v432_v0  ;;  %v1786_v11 = vmul.f32 -1.442695, %v360_v63 }
 0x42d   :  { %2087 = vtanh.f32 %v433_v6  ;;  %v1788_v12 = vmul.f32 -1.442695, %v433_v6 }
 0x42e   :  { %2089 = vpow2.f32 %v1786_v11 }
 0x42f   :  { %2091 = vpow2.f32 %v1788_v12 }
 0x435   :  { %v2086_v7 = vpop.eup %2085 }
 0x436   :  { %374 = vrot.lane.b32.xlu1 %v2086_v7, %s2200_s24 }
 0x437   :  { %v2088_v10 = vpop.eup %2087 }
 0x438   :  { %446 = vrot.lane.b32.xlu0 %v2088_v10, %s2200_s24  ;;  %v2090_v13 = vpop.eup %2089 }
 0x439   :  { %v2092_v14 = vpop.eup %2091  ;;  %v364_v15 = vadd.f32 1.0, %v2090_v13 }
 0x43a   :  { %369 = vrot.lane.b32.xlu1 %v1773_v8, %s2201_s27  ;;  %v437_v16 = vadd.f32 1.0, %v2092_v14 }
 0x43b   :  { %2093 = vrcp.f32 %v364_v15 }
 0x43c   :  { %2095 = vrcp.f32 %v437_v16 }
 0x445   :  { %v2094_v17 = vpop.eup %2093 }
 0x446   :  { %v2096_v22 = vpop.eup %2095 }
 0x447   :  { %v444_v31 = vmul.f32 %v2096_v22, %v442_v28 }
 0x4a8   :  { %v375_v18 = vpop.permute.xlu1 %374 }
 0x4a9   :  { %v377_v19 = vmul.f32 %v2094_v17, %v375_v18 }
 0x4aa   :  { %v447_v23 = vpop.permute.xlu0 %446 }
 0x4ab   :  { %379 = vrot.lane.b32.xlu0 %v377_v19, %s2201_s27  ;;  %v449_v25 = vmul.f32 %v2096_v22, %v447_v23 }
 0x4ac   :  { %v370_v26 = vpop.permute.xlu1 %369 }
 0x4ad   :  { %451 = vrot.lane.b32.xlu1 %v449_v25, %s2201_s27  ;;  %v372_v27 = vmul.f32 %v2094_v17, %v370_v26 }
 0x51d   :  { %v380_v29 = vpop.permute.xlu0 %379 }
 0x51e   :  { %v2428_v30 = vadd.f32 %v380_v29, %v372_v27 }
 0x51f   :  { %v452_v32 = vpop.permute.xlu1 %451 }
 0x520   :  { %2097 = vtanh.f32 %v2428_v30  ;;  %v2431_v33 = vadd.f32 %v452_v32, %v444_v31 }
 0x522   :  { %2099 = vtanh.f32 %v2431_v33  ;;  %v634_v27 = vrot.slane %v2431_v33, 6 }
 0x52a   :  { %v2098_v34 = vpop.eup %2097 }
 0x52b   :  { %385 = vrot.lane.b32.xlu0 %v2098_v34, %s2200_s24 }
 0x52c   :  { %v2100_v35 = vpop.eup %2099 }
 0x52d   :  { %457 = vrot.lane.b32.xlu1 %v2100_v35, %s2200_s24 }
 0x59d   :  { %v386_v36 = vpop.permute.xlu0 %385 }
 0x59e   :  { %v2436_v37 = vmul.f32 %v2094_v17, %v386_v36 }
 0x59f   :  { %v458_v39 = vpop.permute.xlu1 %457 }
 0x5a0   :  { %v462_v38 = vpack.c.bf16 %v2436_v37, %v2436_v37  ;;  %v460_v44 = vmul.f32 %v2096_v22, %v458_v39 }
 0x5a2   :  { %464 = vrot.lane.b32.xlu0 %v462_v38, %s2201_s27  ;;  %v461_v45 = vpack.c.bf16 %v460_v44, %v460_v44 }
 0x5a4   :  { %v510_v46 = vrot.slane %v461_v45, 1 }
 0x5a6   :  { %511 = vrot.lane.b32.xlu1 %v510_v46, %s2201_s27 }
 0x614   :  { %v465_v47 = vpop.permute.xlu0 %464 }
 0x615   :  { %1927 = vmatmul.mubr.msk.bf16.vlgmr.msra.gmra.mrb[8].mxu1 %vm159_vm1, %v465_v47 }
 0x616   :  { %1939 = vmatpush3.bf16.msra.mxu1 %v2302_v3  ;;  %1942 = vmatprep.mubr.msk.bf16.mxu1 %vm2199_vm0, %v2198_v2 }
 0x617   :  { %1940 = vmatprep.subr.bf16.mxu1 %v2198_v2 }
 0x618   :  { %v512_v48 = vpop.permute.xlu1 %511 }
 0x619   :  { %1935 = vmatmul.mubr.msk.bf16.vlgmr.msra.gmra.mrb[12].mxu0 %vm159_vm1, %v512_v48 }
 0x61a   :  { %1941 = vmatpush3.bf16.msra.mxu1 %v2312_v5  ;;  %1947 = vmatpush3.bf16.msra.mxu0 %v2363_v40 }
 0x61b   :  { %1950 = vmatprep.mubr.msk.bf16.mxu0 %vm2199_vm0, %v2198_v2  ;;  %1948 = vmatprep.subr.bf16.mxu0 %v2198_v2 }
 0x61c   :  { %1954 = vmatprep.subr.bf16.mxu1 %v2198_v2 }
 0x61d   :  { %1943 = vmatmul.mubr.msk.bf16.vlgmr.msra.gmra.mrb[12].mxu1 %vm159_vm1, %v512_v48 }
 0x61e   :  { %1955 = vmatpush3.bf16.msra.mxu1 %v2374_v42  ;;  %1958 = vmatprep.mubr.msk.bf16.mxu1 %vm2199_vm0, %v2198_v2 }
 0x61f   :  { %1949 = vmatpush3.bf16.msra.mxu0 %v2368_v41  ;;  %1956 = vmatprep.subr.bf16.mxu1 %v2198_v2 }
 0x620   :  { %1962 = vmatprep.subr.bf16.mxu0 %v2198_v2 }
 0x622   :  { %1957 = vmatpush3.bf16.msra.mxu1 %v2381_v43 }
 0x623   :  { %1970 = vmatprep.subr.bf16.mxu1 %v2198_v2 }
 0x6e8   :  { %v503_v49 = vpop.f32.mrb[8].mxu1 }
 0x6e9   :  { %v1928_v50 = vpop.f32.mrb[9].mxu1 }
 0x6ea   :  { %v506_v51 = vpop.f32.mrb[10].mxu1 }
 0x6eb   :  { %v1929_v52 = vpop.f32.mrb[11].mxu1 }
 0x6ec   :  { %v550_v53 = vpop.f32.mrb[12].mxu0 }
 0x6ed   :  { %v551_v55 = vadd.f32 %v550_v53, %v503_v49  ;;  %v1936_v56 = vpop.f32.mrb[13].mxu0 }
 0x6ee   :  { %v553_v57 = vpop.f32.mrb[14].mxu0 }
 0x6ef   :  { %v556_v58 = vadd.f32 %v2414_v54, %v551_v55  ;;  %v1937_v59 = vpop.f32.mrb[15].mxu0 }
 0x6f0   :  { %v615_v60 = vpop.f32.mrb[12].mxu1 }
 0x6f1   :  { %v622_v61 = vrot.slane %v615_v60, 4  ;;  %v1944_v62 = vpop.f32.mrb[13].mxu1  ;;  %2101 = vtanh.f32 %v556_v58  ;;  %v1791_v8 = vmul.f32 -1.442695, %v556_v58 }
 0x6f2   :  { %v618_v63 = vpop.f32.mrb[14].mxu1 }
 0x6f3   :  { %v624_v0 = vadd.f32 %v622_v61, %v2337_v20  ;;  %v1945_v1 = vpop.f32.mrb[15].mxu1 }
 0x6f5   :  { %v625_v4 = vadd.f32 %v2342_v21, %v624_v0 }
 0x6f7   :  { %2103 = vtanh.f32 %v625_v4  ;;  %v1793_v10 = vmul.f32 -1.442695, %v625_v4 }
 0x6f8   :  { %2105 = vpow2.f32 %v1791_v8 }
 0x6f9   :  { %2107 = vpow2.f32 %v1793_v10 }
 0x6fb   :  { %v2102_v6 = vpop.eup %2101 }
 0x6fc   :  { %566 = vrot.lane.b32.xlu0 %v2102_v6, %s2200_s24 }
 0x701   :  { %v2104_v7 = vpop.eup %2103 }
 0x702   :  { %638 = vrot.lane.b32.xlu1 %v2104_v7, %s2200_s24  ;;  %v2106_v11 = vpop.eup %2105 }
 0x703   :  { %v560_v12 = vadd.f32 1.0, %v2106_v11  ;;  %v2108_v13 = vpop.eup %2107 }
 0x704   :  { %v629_v14 = vadd.f32 1.0, %v2108_v13 }
 0x705   :  { %2109 = vrcp.f32 %v560_v12 }
 0x706   :  { %2111 = vrcp.f32 %v629_v14 }
 0x70f   :  { %v2110_v15 = vpop.eup %2109 }
 0x710   :  { %v2112_v18 = vpop.eup %2111  ;;  %v564_v23 = vmul.f32 %v2110_v15, %v2428_v30 }
 0x711   :  { %v636_v28 = vmul.f32 %v2112_v18, %v634_v27 }
 0x76e   :  { %v567_v16 = vpop.permute.xlu0 %566 }
 0x76f   :  { %v569_v17 = vmul.f32 %v2110_v15, %v567_v16 }
 0x771   :  { %571 = vrot.lane.b32.xlu0 %v569_v17, %s2201_s27 }
 0x774   :  { %v639_v19 = vpop.permute.xlu1 %638 }
 0x775   :  { %v641_v22 = vmul.f32 %v2112_v18, %v639_v19 }
 0x777   :  { %643 = vrot.lane.b32.xlu1 %v641_v22, %s2201_s27 }
 0x7e3   :  { %v572_v25 = vpop.permute.xlu0 %571 }
 0x7e4   :  { %v2471_v26 = vadd.f32 %v572_v25, %v564_v23 }
 0x7e6   :  { %2113 = vtanh.f32 %v2471_v26 }
 0x7e9   :  { %v644_v29 = vpop.permute.xlu1 %643 }
 0x7ea   :  { %v2475_v31 = vadd.f32 %v644_v29, %v636_v28 }
 0x7ec   :  { %2115 = vtanh.f32 %v2475_v31  ;;  %v826_v19 = vrot.slane %v2475_v31, 6 }
 0x7f0   :  { %v2114_v32 = vpop.eup %2113 }
 0x7f1   :  { %577 = vrot.lane.b32.xlu0 %v2114_v32, %s2200_s24 }
 0x7f6   :  { %v2116_v34 = vpop.eup %2115 }
 0x7f7   :  { %649 = vrot.lane.b32.xlu1 %v2116_v34, %s2200_s24 }
 0x863   :  { %v578_v30 = vpop.permute.xlu0 %577 }
 0x864   :  { %v2480_v35 = vmul.f32 %v2110_v15, %v578_v30 }
 0x866   :  { %v654_v33 = vpack.c.bf16 %v2480_v35, %v2480_v35 }
 0x868   :  { %656 = vrot.lane.b32.xlu0 %v654_v33, %s2201_s27 }
 0x869   :  { %v650_v36 = vpop.permute.xlu1 %649 }
 0x86a   :  { %v652_v38 = vmul.f32 %v2112_v18, %v650_v36 }
 0x86c   :  { %v653_v39 = vpack.c.bf16 %v652_v38, %v652_v38 }
 0x86e   :  { %v702_v44 = vrot.slane %v653_v39, 2 }
 0x870   :  { %703 = vrot.lane.b32.xlu1 %v702_v44, %s2201_s27 }
 0x8da   :  { %v657_v45 = vpop.permute.xlu0 %656 }
 0x8db   :  { %1951 = vmatmul.mubr.msk.bf16.vlgmr.msra.gmra.mrb[16].mxu0 %vm159_vm1, %v657_v45 }
 0x8dc   :  { %1963 = vmatpush3.bf16.msra.mxu0 %v2302_v3  ;;  %1966 = vmatprep.mubr.msk.bf16.mxu0 %vm2199_vm0, %v2198_v2 }
 0x8dd   :  { %1964 = vmatprep.subr.bf16.mxu0 %v2198_v2 }
 0x8e0   :  { %1965 = vmatpush3.bf16.msra.mxu0 %v2312_v5 }
 0x8e1   :  { %1978 = vmatprep.subr.bf16.mxu0 %v2198_v2 }
 0x8e2   :  { %v704_v46 = vpop.permute.xlu1 %703 }
 0x8e3   :  { %1959 = vmatmul.mubr.msk.bf16.vlgmr.msra.gmra.mrb[16].mxu1 %vm159_vm1, %v704_v46  ;;  %1967 = vmatmul.mubr.msk.bf16.vlgmr.msra.gmra.mrb[20].mxu0 %vm159_vm1, %v704_v46 }
 0x8e4   :  { %1971 = vmatpush3.bf16.msra.mxu1 %v2363_v40  ;;  %1979 = vmatpush3.bf16.msra.mxu0 %v2374_v42 }
 0x8e5   :  { %1972 = vmatprep.subr.bf16.mxu1 %v2198_v2  ;;  %1974 = vmatprep.mubr.msk.bf16.mxu1 %vm2199_vm0, %v2198_v2 }
 0x8e6   :  { %1980 = vmatprep.subr.bf16.mxu0 %v2198_v2  ;;  %1982 = vmatprep.mubr.msk.bf16.mxu0 %vm2199_vm0, %v2198_v2 }
 0x8e8   :  { %1973 = vmatpush3.bf16.msra.mxu1 %v2368_v41  ;;  %1981 = vmatpush3.bf16.msra.mxu0 %v2381_v43 }
 0x8e9   :  { %1986 = vmatprep.subr.bf16.mxu1 %v2198_v2  ;;  %1994 = vmatprep.subr.bf16.mxu0 %v2198_v2 }
 0x9ae   :  { %v695_v47 = vpop.f32.mrb[16].mxu0 }
 0x9af   :  { %v1952_v48 = vpop.f32.mrb[17].mxu0 }
 0x9b0   :  { %v698_v49 = vpop.f32.mrb[18].mxu0 }
 0x9b1   :  { %v1953_v50 = vpop.f32.mrb[19].mxu0 }
 0x9b6   :  { %v742_v51 = vpop.f32.mrb[16].mxu1  ;;  %v807_v53 = vpop.f32.mrb[20].mxu0 }
 0x9b7   :  { %v743_v52 = vadd.f32 %v742_v51, %v695_v47  ;;  %v1960_v55 = vpop.f32.mrb[17].mxu1  ;;  %v814_v56 = vrot.slane %v807_v53, 2  ;;  %v1968_v57 = vpop.f32.mrb[21].mxu0 }
 0x9b8   :  { %v745_v58 = vpop.f32.mrb[18].mxu1  ;;  %v810_v60 = vpop.f32.mrb[22].mxu0 }
 0x9b9   :  { %v748_v59 = vadd.f32 %v2414_v54, %v743_v52  ;;  %v1961_v61 = vpop.f32.mrb[19].mxu1  ;;  %v816_v62 = vadd.f32 %v814_v56, %v2337_v20  ;;  %v1969_v63 = vpop.f32.mrb[23].mxu0 }
 0x9bb   :  { %2117 = vtanh.f32 %v748_v59  ;;  %v817_v0 = vadd.f32 %v2342_v21, %v816_v62  ;;  %v1796_v6 = vmul.f32 -1.442695, %v748_v59 }
 0x9bd   :  { %2119 = vtanh.f32 %v817_v0  ;;  %v1798_v7 = vmul.f32 -1.442695, %v817_v0 }
 0x9be   :  { %2121 = vpow2.f32 %v1796_v6 }
 0x9bf   :  { %2123 = vpow2.f32 %v1798_v7 }
 0x9c5   :  { %v2118_v1 = vpop.eup %2117 }
 0x9c6   :  { %758 = vrot.lane.b32.xlu0 %v2118_v1, %s2200_s24 }
 0x9c7   :  { %v2120_v4 = vpop.eup %2119 }
 0x9c8   :  { %830 = vrot.lane.b32.xlu1 %v2120_v4, %s2200_s24  ;;  %v2122_v8 = vpop.eup %2121 }
 0x9c9   :  { %v2124_v10 = vpop.eup %2123  ;;  %v752_v11 = vadd.f32 1.0, %v2122_v8 }
 0x9ca   :  { %v821_v12 = vadd.f32 1.0, %v2124_v10 }
 0x9cb   :  { %2125 = vrcp.f32 %v752_v11 }
 0x9cc   :  { %2127 = vrcp.f32 %v821_v12 }
 0x9d5   :  { %v2126_v20 = vpop.eup %2125 }
 0x9d6   :  { %v2128_v15 = vpop.eup %2127  ;;  %v756_v18 = vmul.f32 %v2126_v20, %v2471_v26  ;;  %v1250_v26 = vrot.slane %v2480_v35, 6 }
 0x9d7   :  { %v828_v25 = vmul.f32 %v2128_v15, %v826_v19 }
 0x9d8   :  { %v1259_v38 = vsel %vm1258_vm5, %v2436_v37, %v1250_v26 }
 0xa38   :  { %v759_v13 = vpop.permute.xlu0 %758 }
 0xa39   :  { %v761_v14 = vmul.f32 %v2126_v20, %v759_v13 }
 0xa3a   :  { %v831_v16 = vpop.permute.xlu1 %830 }
 0xa3b   :  { %763 = vrot.lane.b32.xlu0 %v761_v14, %s2201_s27  ;;  %v833_v17 = vmul.f32 %v2128_v15, %v831_v16 }
 0xa3d   :  { %835 = vrot.lane.b32.xlu1 %v833_v17, %s2201_s27 }
 0xaad   :  { %v764_v22 = vpop.permute.xlu0 %763 }
 0xaae   :  { %v2516_v23 = vadd.f32 %v764_v22, %v756_v18 }
 0xaaf   :  { %v836_v27 = vpop.permute.xlu1 %835 }
 0xab0   :  { %2129 = vtanh.f32 %v2516_v23  ;;  %v2519_v28 = vadd.f32 %v836_v27, %v828_v25 }
 0xab2   :  { %2131 = vtanh.f32 %v2519_v28  ;;  %v1015_v11 = vrot.slane %v2519_v28, 6 }
 0xaba   :  { %v2130_v29 = vpop.eup %2129 }
 0xabb   :  { %769 = vrot.lane.b32.xlu0 %v2130_v29, %s2200_s24 }
 0xabc   :  { %v2132_v32 = vpop.eup %2131 }
 0xabd   :  { %841 = vrot.lane.b32.xlu1 %v2132_v32, %s2200_s24 }
 0xb2d   :  { %v770_v31 = vpop.permute.xlu0 %769 }
 0xb2e   :  { %v772_v34 = vmul.f32 %v2126_v20, %v770_v31 }
 0xb2f   :  { %v842_v36 = vpop.permute.xlu1 %841 }
 0xb30   :  { %v846_v30 = vpack.c.bf16 %v772_v34, %v772_v34  ;;  %v1253_v33 = vrot.slane %v772_v34, 4  ;;  %v844_v39 = vmul.f32 %v2128_v15, %v842_v36 }
 0xb32   :  { %848 = vrot.lane.b32.xlu0 %v846_v30, %s2201_s27  ;;  %v2527_v44 = vsel %vm1260_vm6, %v1259_v38, %v1253_v33  ;;  %v845_v45 = vpack.c.bf16 %v844_v39, %v844_v39 }
 0xb34   :  { %v894_v46 = vrot.slane %v845_v45, 3 }
 0xb36   :  { %895 = vrot.lane.b32.xlu1 %v894_v46, %s2201_s27 }
 0xba4   :  { %v849_v47 = vpop.permute.xlu0 %848 }
 0xba5   :  { %1975 = vmatmul.mubr.msk.bf16.vlgmr.msra.gmra.mrb[20].mxu1 %vm159_vm1, %v849_v47 }
 0xba6   :  { %1987 = vmatpush3.bf16.msra.mxu1 %v2302_v3  ;;  %1990 = vmatprep.mubr.msk.bf16.mxu1 %vm2199_vm0, %v2198_v2 }
 0xba7   :  { %1988 = vmatprep.subr.bf16.mxu1 %v2198_v2 }
 0xba8   :  { %v896_v37 = vpop.permute.xlu1 %895 }
 0xba9   :  { %1983 = vmatmul.mubr.msk.bf16.vlgmr.msra.gmra.mrb[24].mxu0 %vm159_vm1, %v896_v37 }
 0xbaa   :  { %1989 = vmatpush3.bf16.msra.mxu1 %v2312_v5  ;;  %1995 = vmatpush3.bf16.msra.mxu0 %v2363_v40 }
 0xbab   :  { %2002 = vmatprep.subr.bf16.mxu1 %v2198_v2  ;;  %1996 = vmatprep.subr.bf16.mxu0 %v2198_v2 }
 0xbac   :  { %1998 = vmatprep.mubr.msk.bf16.mxu0 %vm2199_vm0, %v2198_v2 }
 0xbad   :  { %1991 = vmatmul.mubr.msk.bf16.vlgmr.msra.gmra.mrb[24].mxu1 %vm159_vm1, %v896_v37 }
 0xbae   :  { %2003 = vmatpush3.bf16.msra.mxu1 %v2374_v42  ;;  %2006 = vmatprep.mubr.msk.bf16.mxu1 %vm2199_vm0, %v2198_v2 }
 0xbaf   :  { %1997 = vmatpush3.bf16.msra.mxu0 %v2368_v41  ;;  %2004 = vmatprep.subr.bf16.mxu1 %v2198_v2 }
 0xbb0   :  { %2010 = vmatprep.subr.bf16.mxu0 %v2198_v2 }
 0xbb2   :  { %2005 = vmatpush3.bf16.msra.mxu1 %v2381_v43 }
 0xbb3   :  { %2018 = vmatprep.subr.bf16.mxu1 %v2198_v2 }
 0xc78   :  { %v887_v3 = vpop.f32.mrb[20].mxu1 }
 0xc79   :  { %v1976_v5 = vpop.f32.mrb[21].mxu1 }
 0xc7a   :  { %v890_v40 = vpop.f32.mrb[22].mxu1 }
 0xc7b   :  { %v1977_v35 = vpop.f32.mrb[23].mxu1 }
 0xc7c   :  { %v934_v48 = vpop.f32.mrb[24].mxu0 }
 0xc7d   :  { %v935_v49 = vadd.f32 %v934_v48, %v887_v3  ;;  %v1984_v42 = vpop.f32.mrb[25].mxu0 }
 0xc7e   :  { %v937_v50 = vpop.f32.mrb[26].mxu0 }
 0xc7f   :  { %v940_v51 = vadd.f32 %v2414_v54, %v935_v49  ;;  %v1985_v52 = vpop.f32.mrb[27].mxu0 }
 0xc80   :  { %v999_v41 = vpop.f32.mrb[24].mxu1  ;;  %v2072_v52 = vld [vmem:[%s2742_s12 + $0x8] sm:$0xff]  }
 0xc81   :  { %v1005_v53 = vadd.f32 %v999_v41, %v2345_v24  ;;  %v1992_v55 = vpop.f32.mrb[25].mxu1  ;;  %2133 = vtanh.f32 %v940_v51  ;;  %v1801_v60 = vmul.f32 -1.442695, %v940_v51  ;;  %v2071_v51 = vld [vmem:[%s2743_s10] sm:$0xff]  }
 0xc82   :  { %v1002_v56 = vpop.f32.mrb[26].mxu1  ;;  %v2074_v55 = vld [vmem:[%s2744_s1] sm:$0xff]  }
 0xc83   :  { %v1006_v43 = vadd.f32 %v2342_v21, %v1005_v53  ;;  %v1993_v57 = vpop.f32.mrb[27].mxu1  ;;  %v2073_v53 = vld [vmem:[%s2743_s10 + $0x8] sm:$0xff]  }
 0xc85   :  { %2135 = vtanh.f32 %v1006_v43  ;;  %v1803_v61 = vmul.f32 -1.442695, %v1006_v43 }
 0xc86   :  { %2137 = vpow2.f32 %v1801_v60 }
 0xc87   :  { %2139 = vpow2.f32 %v1803_v61 }
 0xc8b   :  { %v2134_v58 = vpop.eup %2133 }
 0xc8c   :  { %950 = vrot.lane.b32.xlu0 %v2134_v58, %s2200_s24 }
 0xc8f   :  { %v2136_v59 = vpop.eup %2135 }
 0xc90   :  { %1019 = vrot.lane.b32.xlu1 %v2136_v59, %s2200_s24  ;;  %v2138_v62 = vpop.eup %2137 }
 0xc91   :  { %v2140_v63 = vpop.eup %2139  ;;  %v944_v24 = vadd.f32 1.0, %v2138_v62 }
 0xc92   :  { %v1010_v0 = vadd.f32 1.0, %v2140_v63  ;;  %v2075_v63 = vld [vmem:[%s2745_s14] sm:$0xff]  }
 0xc93   :  { %2141 = vrcp.f32 %v944_v24  ;;  %v2076_v24 = vld [vmem:[%s2745_s14 + $0x8] sm:$0xff]  }
 0xc94   :  { %2143 = vrcp.f32 %v1010_v0  ;;  %v2202_v0 = vmov 1966171168  }
 0xc9d   :  { %v2142_v1 = vpop.eup %2141 }
 0xc9e   :  { %v2144_v6 = vpop.eup %2143  ;;  %v948_v10 = vmul.f32 %v2142_v1, %v2516_v23 }
 0xc9f   :  { %v1017_v13 = vmul.f32 %v2144_v6, %v1015_v11 }
 0xcfe   :  { %v951_v21 = vpop.permute.xlu0 %950 }
 0xcff   :  { %v953_v4 = vmul.f32 %v2142_v1, %v951_v21 }
 0xd01   :  { %955 = vrot.lane.b32.xlu0 %v953_v4, %s2201_s27  ;;  %v1340_v4 = vshrl.u32 %v58_v9, 7 }
 0xd02   :  { %v1020_v7 = vpop.permute.xlu1 %1019 }
 0xd03   :  { %v1022_v8 = vmul.f32 %v2144_v6, %v1020_v7 }
 0xd05   :  { %1024 = vrot.lane.b32.xlu1 %v1022_v8, %s2201_s27 }
 0xd73   :  { %v956_v12 = vpop.permute.xlu0 %955 }
 0xd74   :  { %v958_v20 = vadd.f32 %v956_v12, %v948_v10 }
 0xd76   :  { %2145 = vtanh.f32 %v958_v20 }
 0xd77   :  { %v1025_v14 = vpop.permute.xlu1 %1024 }
 0xd78   :  { %v2560_v15 = vadd.f32 %v1025_v14, %v1017_v13 }
 0xd7a   :  { %2147 = vtanh.f32 %v2560_v15 }
 0xd80   :  { %v2146_v16 = vpop.eup %2145 }
 0xd81   :  { %961 = vrot.lane.b32.xlu0 %v2146_v16, %s2200_s24 }
 0xd84   :  { %v2148_v17 = vpop.eup %2147 }
 0xd85   :  { %1030 = vrot.lane.b32.xlu1 %v2148_v17, %s2200_s24  ;;  %v1807_v17 = vld [vmem:[%s2747_s11] ss:$0 sm:$0xff] }
 0xdf3   :  { %v962_v18 = vpop.permute.xlu0 %961 }
 0xdf4   :  { %v964_v19 = vmul.f32 %v2142_v1, %v962_v18  ;;  %v1337_v1 = vunpack.c.l.s4 %v2202_v0 }
 0xdf6   :  { %v1035_v22 = vpack.c.bf16 %v964_v19, %v964_v19  ;;  %v1256_v23 = vrot.slane %v964_v19, 2  ;;  %v1338_v21 = vunpack.c.0.s8 %v1337_v1 }
 0xdf7   :  { %v1031_v25 = vpop.permute.xlu1 %1030 }
 0xdf8   :  { %v2565_v27 = vmul.f32 %v2144_v6, %v1031_v25  ;;  %1037 = vrot.lane.b32.xlu0 %v1035_v22, %s2201_s27  ;;  %v1263_v28 = vsel %vm1262_vm7, %v2527_v44, %v1256_v23  ;;  %v1812_v6 = vld [vmem:[%s2746_s13] ss:$0 sm:$0xff]  ;;  %v1341_v7 = vsub.s32 %v1338_v21, %v1340_v4 }
 0xdfa   :  { %v1034_v29 = vpack.c.bf16 %v2565_v27, %v2565_v27 }
 0xdfc   :  { %1083 = vrot.lane.b32.xlu1 %v1034_v29, %s2201_s27 }
 0xe6a   :  { %v1038_v32 = vpop.permute.xlu0 %1037 }
 0xe6b   :  { %1999 = vmatmul.mubr.msk.bf16.vlgmr.msra.gmra.mrb[28].mxu0 %vm159_vm1, %v1038_v32 }
 0xe6c   :  { %2014 = vmatprep.mubr.msk.bf16.mxu0 %vm2199_vm0, %v2198_v2  ;;  %2011 = vmatpush3.bf16.msra.mxu0 %v2071_v51 }
 0xe6d   :  { %2012 = vmatprep.subr.bf16.mxu0 %v2198_v2 }
 0xe6e   :  { %v1084_v26 = vpop.permute.xlu1 %1083 }
 0xe6f   :  { %2007 = vmatmul.mubr.msk.bf16.vlgmr.msra.gmra.mrb[28].mxu1 %vm159_vm1, %v1084_v26 }
 0xe70   :  { %2022 = vmatprep.mubr.msk.bf16.mxu1 %vm2199_vm0, %v2198_v2  ;;  %2013 = vmatpush3.bf16.msra.mxu0 %v2073_v53 }
 0xe71   :  { %2026 = vmatprep.subr.bf16.mxu0 %v2198_v2 }
 0xe73   :  { %2015 = vmatmul.mubr.msk.bf16.vlgmr.msra.gmra.mrb[32].mxu0 %vm159_vm1, %v2074_v55 }
 0xe74   :  { %2030 = vmatprep.mubr.msk.bf16.mxu0 %vm2199_vm0, %v2198_v2  ;;  %2027 = vmatpush3.bf16.msra.mxu0 %v2075_v63 }
 0xe75   :  { %2028 = vmatprep.subr.bf16.mxu0 %v2198_v2 }
 0xe78   :  { %2029 = vmatpush3.bf16.msra.mxu0 %v2076_v24 }
 0xf3e   :  { %v1076_v31 = vpop.f32.mrb[28].mxu0 }
 0xf3f   :  { %v2000_v34 = vpop.f32.mrb[29].mxu0 }
 0xf40   :  { %v1079_v30 = vpop.f32.mrb[30].mxu0 }
 0xf41   :  { %v2001_v33 = vpop.f32.mrb[31].mxu0 }
 0xf42   :  { %v1122_v36 = vpop.f32.mrb[28].mxu1 }
 0xf43   :  { %v1123_v38 = vadd.f32 %v1122_v36, %v1076_v31  ;;  %v2008_v39 = vpop.f32.mrb[29].mxu1 }
 0xf44   :  { %v1125_v44 = vpop.f32.mrb[30].mxu1 }
 0xf45   :  { %v1128_v45 = vadd.f32 %v2414_v54, %v1123_v38  ;;  %v2009_v46 = vpop.f32.mrb[31].mxu1  ;;  %v2070_v54 = vld [vmem:[%s2742_s12] sm:$0xff]  }
 0xf46   :  { %2019 = vmatpush3.bf16.msra.mxu1 %v2070_v54  ;;  %v1242_v59 = vpop.f32.mrb[32].mxu0 }
 0xf47   :  { %2149 = vtanh.f32 %v1128_v45  ;;  %v1806_v37 = vmul.f32 -1.442695, %v1128_v45  ;;  %2020 = vmatprep.subr.bf16.mxu1 %v2198_v2  ;;  %v2016_v60 = vpop.f32.mrb[33].mxu0  ;;  %v1243_v25 = vadd.f32 %v1807_v17, %v1242_v59 }
 0xf48   :  { %v1245_v61 = vpop.f32.mrb[34].mxu0 }
 0xf49   :  { %2151 = vpow2.f32 %v1806_v37  ;;  %v2017_v62 = vpop.f32.mrb[35].mxu0  ;;  %v1246_v33 = vadd.f32 %v1807_v17, %v1245_v61 }
 0xf4a   :  { %2021 = vmatpush3.bf16.msra.mxu1 %v2072_v52 }
 0xf4b   :  { %2050 = vmatprep.subr.bf16.mxu1 %v2198_v2 }
 0xf51   :  { %v2150_v47 = vpop.eup %2149 }
 0xf52   :  { %1138 = vrot.lane.b32.xlu0 %v2150_v47, %s2200_s24 }
 0xf53   :  { %v2152_v3 = vpop.eup %2151 }
 0xf54   :  { %v1132_v5 = vadd.f32 1.0, %v2152_v3 }
 0xf56   :  { %2153 = vrcp.f32 %v1132_v5 }
 0xf60   :  { %v2154_v40 = vpop.eup %2153 }
 0xf61   :  { %v1136_v49 = vmul.f32 %v2154_v40, %v958_v20  ;;  %v1360_v20 = vsub.s32 0, %v1340_v4 }
 0xfc4   :  { %v1139_v35 = vpop.permute.xlu0 %1138 }
 0xfc5   :  { %v1141_v48 = vmul.f32 %v2154_v40, %v1139_v35 }
 0xfc7   :  { %1143 = vrot.lane.b32.xlu1 %v1141_v48, %s2201_s27 }
0x1039   :  { %v1144_v42 = vpop.permute.xlu1 %1143 }
0x103a   :  { %v2581_v50 = vadd.f32 %v1144_v42, %v1136_v49 }
0x103c   :  { %2155 = vtanh.f32 %v2581_v50 }
0x1046   :  { %v2156_v41 = vpop.eup %2155 }
0x1047   :  { %1149 = vrot.lane.b32.xlu0 %v2156_v41, %s2200_s24 }
0x10b9   :  { %v1150_v56 = vpop.permute.xlu0 %1149 }
0x10ba   :  { %v2607_v43 = vmul.f32 %v2154_v40, %v1150_v56 }
0x10bc   :  { %v1264_v57 = vpack.c.bf16 %v2607_v43, %v1263_v28 }
0x10be   :  { %1277 = vrot.lane.b32.xlu1 %v1264_v57, %s2201_s27 }
0x1130   :  { %v1278_v58 = vpop.permute.xlu1 %1277 }
0x1131   :  { %2023 = vmatmul.mubr.msk.bf16.vlgmr.msra.gmra.mrb[32].mxu1 %vm159_vm1, %v1278_v58 }
0x1132   :  { %2042 = vmatprep.mubr.msk.bf16.mxu1 %vm2199_vm0, %v2198_v2  ;;  %2052 = vmatpush3.bf16.msra.mxu1 %v2075_v63 }
0x1133   :  { %2051 = vmatprep.subr.bf16.mxu1 %v2198_v2 }
0x1136   :  { %2053 = vmatpush3.bf16.msra.mxu1 %v2076_v24 }
0x1204   :  { %v1328_v8 = vpop.f32.mrb[32].mxu1 }
0x1205   :  { %v1329_v10 = vadd.f32 %v1812_v6, %v1328_v8  ;;  %v2024_v11 = vpop.f32.mrb[33].mxu1 }
0x1206   :  { %v1331_v12 = vpop.f32.mrb[34].mxu1 }
0x1207   :  { %v1342_v13 = vrot.slane %v1329_v10, %v1341_v7  ;;  %v1388_v14 = vcombine.high %v1329_v10, %v1329_v10  ;;  %v1332_v16 = vadd.f32 %v1812_v6, %v1331_v12  ;;  %v2025_v18 = vpop.f32.mrb[35].mxu1 }
0x1209   :  { %v1343_v19 = vcombine.high %v1342_v13, %v1342_v13  ;;  %v1350_v9 = vrot.slane %v1342_v13, %v1341_v7  ;;  %v1395_v22 = vrot.slane %v1388_v14, %v1341_v7  ;;  %v1448_v23 = vrot.slane %v1332_v16, %v1341_v7  ;;  %v1816_v14 = vld [vmem:[%s2748_s15] ss:$0 sm:$0xff]  ;;  %s2203_s15 = smov 48  }
0x120b   :  { %v1357_v28 = vrot.slane %v1343_v19, %v1341_v7  ;;  %v1361_v29 = vrot.slane %v1350_v9, %v1360_v20  ;;  %v1372_v32 = vcombine.high %v1350_v9, %v1350_v9  ;;  %v1396_v26 = vcombine.high %v1395_v22, %v1395_v22 }
0x120c   :  { %v1403_v31 = vrot.slane %v1395_v22, %v1341_v7  ;;  %v1449_v34 = vcombine.high %v1448_v23, %v1448_v23  ;;  %v1456_v30 = vrot.slane %v1448_v23, %v1341_v7 }
0x120d   :  { %v1365_v36 = vrot.slane %v1357_v28, %v1360_v20  ;;  %v1373_v38 = vcombine.high %v1357_v28, %v1357_v28  ;;  %v1377_v39 = vrot.slane %v1372_v32, %v1360_v20  ;;  %v1410_v44 = vrot.slane %v1396_v26, %v1341_v7 }
0x120e   :  { %v1414_v45 = vrot.slane %v1403_v31, %v1360_v20  ;;  %v1425_v46 = vcombine.high %v1403_v31, %v1403_v31  ;;  %v1463_v47 = vrot.slane %v1449_v34, %v1341_v7  ;;  %v1467_v37 = vrot.slane %v1456_v30, %v1360_v20 }
0x120f   :  { %v1381_v3 = vrot.slane %v1373_v38, %v1360_v20  ;;  %v1418_v5 = vrot.slane %v1410_v44, %v1360_v20  ;;  %v1426_v40 = vcombine.high %v1410_v44, %v1410_v44  ;;  %v1368_v35 = vadd.f32 %v1361_v29, %v1243_v25 }
0x1210   :  { %v1430_v48 = vrot.slane %v1425_v46, %v1360_v20  ;;  %v1471_v49 = vrot.slane %v1463_v47, %v1360_v20  ;;  %v1369_v42 = vadd.f32 %v1365_v36, %v1246_v33  ;;  %v1384_v54 = vadd.f32 %v1377_v39, %v1243_v25 }
0x1211   :  { %v1434_v51 = vrot.slane %v1426_v40, %v1360_v20  ;;  %v1385_v52 = vadd.f32 %v1381_v3, %v1246_v33  ;;  %v1474_v41 = vadd.f32 %v1467_v37, %v1243_v25  ;;  %v1370_v53 = vmax.f32 %v1368_v35, 0.0 }
0x1212   :  { %v1437_v55 = vadd.f32 %v1430_v48, %v1243_v25  ;;  %v1371_v56 = vmax.f32 %v1369_v42, 0.0  ;;  %v1475_v57 = vadd.f32 %v1471_v49, %v1246_v33  ;;  %v1386_v59 = vmax.f32 %v1384_v54, 0.0 }
0x1213   :  { %v1438_v58 = vadd.f32 %v1434_v51, %v1246_v33  ;;  %v1387_v60 = vmax.f32 %v1385_v52, 0.0  ;;  %v1421_v61 = vadd.f32 %v1414_v45, %v1243_v25  ;;  %v1476_v63 = vmax.f32 %v1474_v41, 0.0 }
0x1214   :  { %v1478_v62 = vpack.c.bf16 %v1371_v56, %v1370_v53  ;;  %v1477_v24 = vmax.f32 %v1475_v57, 0.0  ;;  %v1422_v0 = vadd.f32 %v1418_v5, %v1246_v33  ;;  %v1439_v1 = vmax.f32 %v1437_v55, 0.0 }
0x1215   :  { %v1440_v21 = vmax.f32 %v1438_v58, 0.0  ;;  %v1479_v4 = vpack.c.bf16 %v1387_v60, %v1386_v59  ;;  %v1423_v7 = vmax.f32 %v1421_v61, 0.0 }
0x1216   :  { %2031 = vmatmul.mubr.msk.bf16.vlgmr.msra.gmra.mrb[36].mxu0 %vm159_vm1, %v1478_v62  ;;  %v1482_v6 = vpack.c.bf16 %v1477_v24, %v1476_v63  ;;  %v1424_v8 = vmax.f32 %v1422_v0, 0.0 }
0x1217   :  { %v1481_v10 = vpack.c.bf16 %v1440_v21, %v1439_v1  ;;  %2034 = vmatprep.mubr.msk.bf16.mxu0 %vm2199_vm0, %v2198_v2 }
0x1218   :  { %v1480_v11 = vpack.c.bf16 %v1424_v8, %v1423_v7 }
0x1219   :  { %2043 = vmatmul.mubr.msk.bf16.vlgmr.msra.gmra.mrb[36].mxu1 %vm159_vm1, %v1481_v10 }
0x121a   :  { %2046 = vmatprep.mubr.msk.bf16.mxu1 %vm2199_vm0, %v2198_v2 }
0x121e   :  { %2035 = vmatmul.mubr.msk.bf16.gmra.mrb[40].mxu0 %vm159_vm1, %v1479_v4 }
0x121f   :  { %2038 = vmatprep.mubr.msk.bf16.mxu0 %vm2199_vm0, %v2198_v2 }
0x1221   :  { %2047 = vmatmul.mubr.msk.bf16.gmra.mrb[40].mxu1 %vm159_vm1, %v1482_v6 }
0x1226   :  { %2039 = vmatmul.mubr.msk.bf16.gmra.mrb[44].mxu0 %vm159_vm1, %v1480_v11 }
0x12e9   :  { %v1555_v12 = vpop.f32.mrb[36].mxu0 }
0x12ea   :  { %v2032_v20 = vpop.f32.mrb[37].mxu0  ;;  %v1556_v47 = vadd.f32 %v1816_v14, %v1555_v12 }
0x12eb   :  { %v1558_v13 = vpop.f32.mrb[38].mxu0 }
0x12ec   :  { %v2033_v16 = vpop.f32.mrb[39].mxu0  ;;  %v1579_v17 = vpop.f32.mrb[36].mxu1  ;;  %v1594_v42 = vsel %vm81_vm4, %v1556_v47, -inf  ;;  %v1559_v52 = vadd.f32 %v1816_v14, %v1558_v13 }
0x12ed   :  { %v1580_v18 = vadd.f32 %v1816_v14, %v1579_v17  ;;  %v2044_v19 = vpop.f32.mrb[37].mxu1 }
0x12ee   :  { %v1582_v9 = vpop.f32.mrb[38].mxu1  ;;  %v1597_v53 = vsel %vm81_vm4, %v1559_v52, -inf }
0x12ef   :  { %v1583_v22 = vadd.f32 %v1816_v14, %v1582_v9  ;;  %v2045_v23 = vpop.f32.mrb[39].mxu1  ;;  %v1612_v2 = vsel %vm81_vm4, %v1580_v18, -inf }
0x12f0   :  { %1613 = vmax.xlane.f32.xlu1 %v1612_v2 }
0x12f1   :  { %v1563_v25 = vpop.f32.mrb[40].mxu0  ;;  %v1615_v28 = vsel %vm81_vm4, %v1583_v22, -inf }
0x12f2   :  { %v1564_v29 = vadd.f32 %v1816_v14, %v1563_v25  ;;  %v2036_v32 = vpop.f32.mrb[41].mxu0  ;;  %1616 = vmax.xlane.f32.xlu0 %v1615_v28 }
0x12f3   :  { %v1566_v26 = vpop.f32.mrb[42].mxu0 }
0x12f4   :  { %v1567_v31 = vadd.f32 %v1816_v14, %v1566_v26  ;;  %v2037_v34 = vpop.f32.mrb[43].mxu0  ;;  %v1587_v30 = vpop.f32.mrb[40].mxu1  ;;  %v1600_v36 = vsel %vm81_vm4, %v1564_v29, -inf }
0x12f5   :  { %v2048_v33 = vpop.f32.mrb[41].mxu1  ;;  %v1588_v38 = vadd.f32 %v1816_v14, %v1587_v30 }
0x12f6   :  { %v1590_v39 = vpop.f32.mrb[42].mxu1  ;;  %1601 = vmax.xlane.f32.xlu0 %v1600_v36  ;;  %v1603_v44 = vsel %vm81_vm4, %v1567_v31, -inf }
0x12f7   :  { %1604 = vmax.xlane.f32.xlu1 %v1603_v44  ;;  %v2049_v45 = vpop.f32.mrb[43].mxu1  ;;  %v1618_v5 = vsel %vm81_vm4, %v1588_v38, -inf  ;;  %v1591_v54 = vadd.f32 %v1816_v14, %v1590_v39 }
0x12f9   :  { %v1571_v46 = vpop.f32.mrb[44].mxu0  ;;  %v1621_v41 = vsel %vm81_vm4, %v1591_v54, -inf }
0x12fa   :  { %v1572_v37 = vadd.f32 %v1816_v14, %v1571_v46  ;;  %v2040_v3 = vpop.f32.mrb[45].mxu0 }
0x12fb   :  { %1619 = vmax.xlane.f32.xlu1 %v1618_v5  ;;  %v1574_v40 = vpop.f32.mrb[46].mxu0 }
0x12fc   :  { %v1575_v35 = vadd.f32 %v1816_v14, %v1574_v40  ;;  %v2041_v48 = vpop.f32.mrb[47].mxu0  ;;  %v1606_v49 = vsel %vm81_vm4, %v1572_v37, -inf }
0x12fd   :  { %1607 = vmax.xlane.f32.xlu0 %v1606_v49 }
0x12fe   :  { %v1609_v51 = vsel %vm81_vm4, %v1575_v35, -inf }
0x12ff   :  { %1595 = vmax.xlane.f32.xlu1 %v1594_v42 }
0x1301   :  { %1610 = vmax.xlane.f32.xlu0 %v1609_v51 }
0x1305   :  { %1622 = vmax.xlane.f32.xlu0 %v1621_v41 }
0x1309   :  { %1598 = vmax.xlane.f32.xlu0 %v1597_v53 }
0x137d   :  { %v1614_v55 = vpop.xlane.xlu1 %1613 }
0x137e   :  { %v2653_v56 = vsub.f32 %v1580_v18, %v1614_v55 }
0x137f   :  { %v1617_v57 = vpop.xlane.xlu0 %1616 }
0x1380   :  { %v1646_v58 = vmul.f32 1.442695, %v2653_v56  ;;  %v2656_v59 = vsub.f32 %v1583_v22, %v1617_v57 }
0x1382   :  { %2157 = vpow2.f32 %v1646_v58  ;;  %v1648_v60 = vmul.f32 1.442695, %v2656_v59 }
0x1383   :  { %v1602_v61 = vpop.xlane.xlu0 %1601 }
0x1384   :  { %2159 = vpow2.f32 %v1648_v60  ;;  %v2659_v62 = vsub.f32 %v1564_v29, %v1602_v61  ;;  %v1605_v63 = vpop.xlane.xlu1 %1604 }
0x1385   :  { %v2661_v24 = vsub.f32 %v1567_v31, %v1605_v63 }
0x1386   :  { %v1638_v0 = vmul.f32 1.442695, %v2659_v62 }
0x1387   :  { %v1640_v1 = vmul.f32 1.442695, %v2661_v24 }
0x1388   :  { %2161 = vpow2.f32 %v1638_v0  ;;  %v1620_v21 = vpop.xlane.xlu1 %1619 }
0x1389   :  { %2163 = vpow2.f32 %v1640_v1  ;;  %v2665_v4 = vsub.f32 %v1588_v38, %v1620_v21 }
0x138a   :  { %v1608_v6 = vpop.xlane.xlu0 %1607 }
0x138b   :  { %v2667_v7 = vsub.f32 %v1572_v37, %v1608_v6  ;;  %v1650_v11 = vmul.f32 1.442695, %v2665_v4 }
0x138c   :  { %v2158_v8 = vpop.eup %2157  ;;  %v1596_v10 = vpop.xlane.xlu1 %1595 }
0x138d   :  { %v1642_v12 = vmul.f32 1.442695, %v2667_v7  ;;  %v2671_v20 = vsub.f32 %v1556_v47, %v1596_v10  ;;  %v1672_v13 = vsel %vm81_vm4, %v2158_v8, 0.0 }
0x138e   :  { %v2160_v14 = vpop.eup %2159  ;;  %v1611_v16 = vpop.xlane.xlu0 %1610  ;;  %1673 = vadd.xlane.f32.xlu1 %v1672_v13 }
0x138f   :  { %2165 = vpow2.f32 %v1642_v12  ;;  %v2674_v17 = vsub.f32 %v1575_v35, %v1611_v16  ;;  %v1675_v18 = vsel %vm81_vm4, %v2160_v14, 0.0  ;;  %v1634_v19 = vmul.f32 1.442695, %v2671_v20 }
0x1390   :  { %1676 = vadd.xlane.f32.xlu0 %v1675_v18  ;;  %2167 = vpow2.f32 %v1650_v11 }
0x1391   :  { %v1644_v9 = vmul.f32 1.442695, %v2674_v17 }
0x1392   :  { %v2162_v22 = vpop.eup %2161  ;;  %v1623_v23 = vpop.xlane.xlu0 %1622 }
0x1393   :  { %v2164_v2 = vpop.eup %2163  ;;  %2169 = vpow2.f32 %v1644_v9  ;;  %v2679_v25 = vsub.f32 %v1591_v54, %v1623_v23  ;;  %v1660_v28 = vsel %vm81_vm4, %v2162_v22, 0.0 }
0x1394   :  { %1661 = vadd.xlane.f32.xlu1 %v1660_v28  ;;  %v1663_v29 = vsel %vm81_vm4, %v2164_v2, 0.0  ;;  %2171 = vpow2.f32 %v1634_v19 }
0x1395   :  { %v1652_v32 = vmul.f32 1.442695, %v2679_v25  ;;  %1664 = vadd.xlane.f32.xlu0 %v1663_v29 }
0x1396   :  { %v1599_v26 = vpop.xlane.xlu0 %1598 }
0x1397   :  { %2173 = vpow2.f32 %v1652_v32  ;;  %v2684_v31 = vsub.f32 %v1559_v52, %v1599_v26 }
0x1399   :  { %v2166_v34 = vpop.eup %2165  ;;  %v1636_v30 = vmul.f32 1.442695, %v2684_v31 }
0x139a   :  { %v1666_v33 = vsel %vm81_vm4, %v2166_v34, 0.0  ;;  %v2168_v36 = vpop.eup %2167 }
0x139b   :  { %2175 = vpow2.f32 %v1636_v30  ;;  %1667 = vadd.xlane.f32.xlu1 %v1666_v33  ;;  %v1678_v39 = vsel %vm81_vm4, %v2168_v36, 0.0 }
0x139d   :  { %v2170_v38 = vpop.eup %2169 }
0x139e   :  { %v1669_v44 = vsel %vm81_vm4, %v2170_v38, 0.0  ;;  %v2172_v45 = vpop.eup %2171 }
0x139f   :  { %1679 = vadd.xlane.f32.xlu1 %v1678_v39  ;;  %1670 = vadd.xlane.f32.xlu0 %v1669_v44  ;;  %v1654_v47 = vsel %vm81_vm4, %v2172_v45, 0.0 }
0x13a1   :  { %v2174_v46 = vpop.eup %2173 }
0x13a2   :  { %v1681_v37 = vsel %vm81_vm4, %v2174_v46, 0.0 }
0x13a3   :  { %1655 = vadd.xlane.f32.xlu1 %v1654_v47  ;;  %1682 = vadd.xlane.f32.xlu0 %v1681_v37 }
0x13a5   :  { %v2176_v3 = vpop.eup %2175 }
0x13a6   :  { %v1657_v5 = vsel %vm81_vm4, %v2176_v3, 0.0 }
0x13a7   :  { %1658 = vadd.xlane.f32.xlu0 %v1657_v5 }
0x13b4   :  { %1158 = vrot.lane.b32.xlu1 %v2607_v43, %s2200_s24 }
0x13bd   :  { %1154 = vrot.lane.b32.xlu0 %v2565_v27, %s2201_s27 }
0x13c1   :  { %1162 = vrot.lane.b32.xlu0 %v2560_v15, %s2201_s27 }
0x141b   :  { %v1674_v40 = vpop.xlane.xlu1 %1673 }
0x141c   :  { %2177 = vlog2.f32 %v1674_v40 }
0x141d   :  { %v1677_v35 = vpop.xlane.xlu0 %1676 }
0x141e   :  { %2179 = vlog2.f32 %v1677_v35 }
0x1421   :  { %v1662_v48 = vpop.xlane.xlu1 %1661 }
0x1422   :  { %2181 = vlog2.f32 %v1662_v48  ;;  %v1665_v49 = vpop.xlane.xlu0 %1664 }
0x1423   :  { %2183 = vlog2.f32 %v1665_v49 }
0x1426   :  { %v2178_v42 = vpop.eup %2177 }
0x1427   :  { %v1697_v54 = vmul.f32 0.6931472, %v2178_v42 }
0x1428   :  { %v2180_v51 = vpop.eup %2179  ;;  %v1668_v52 = vpop.xlane.xlu1 %1667 }
0x1429   :  { %v1699_v41 = vmul.f32 0.6931472, %v2180_v51  ;;  %v1710_v43 = vsub.f32 %v2653_v56, %v1697_v54  ;;  %2185 = vlog2.f32 %v1668_v52 }
0x142b   :  { %1732 = vrot.lane.b32.xlu0 %v1710_v43, %s2203_s15  ;;  %v1711_v27 = vsub.f32 %v2656_v59, %v1699_v41 }
0x142c   :  { %v2182_v15 = vpop.eup %2181  ;;  %v1680_v53 = vpop.xlane.xlu1 %1679 }
0x142d   :  { %v1671_v55 = vpop.xlane.xlu0 %1670  ;;  %v2184_v57 = vpop.eup %2183  ;;  %v1689_v58 = vmul.f32 0.6931472, %v2182_v15  ;;  %2187 = vlog2.f32 %v1680_v53  ;;  %1734 = vrot.lane.b32.xlu1 %v1711_v27, %s2203_s15 }
0x142e   :  { %v1691_v60 = vmul.f32 0.6931472, %v2184_v57  ;;  %2189 = vlog2.f32 %v1671_v55 }
0x142f   :  { %v1706_v61 = vsub.f32 %v2659_v62, %v1689_v58 }
0x1430   :  { %v1707_v0 = vsub.f32 %v2661_v24, %v1691_v60 }
0x1431   :  { %v1683_v63 = vpop.xlane.xlu0 %1682  ;;  %1716 = vrot.lane.b32.xlu1 %v1706_v61, %s2204_s2 }
0x1432   :  { %2191 = vlog2.f32 %v1683_v63  ;;  %1718 = vrot.lane.b32.xlu0 %v1707_v0, %s2204_s2 }
0x1433   :  { %v2186_v56 = vpop.eup %2185 }
0x1434   :  { %v1693_v21 = vmul.f32 0.6931472, %v2186_v56 }
0x1435   :  { %v1659_v14 = vpop.xlane.xlu0 %1658 }
0x1436   :  { %v1708_v12 = vsub.f32 %v2667_v7, %v1693_v21 }
0x1437   :  { %v2188_v59 = vpop.eup %2187 }
0x1438   :  { %v1701_v1 = vmul.f32 0.6931472, %v2188_v59  ;;  %v2190_v8 = vpop.eup %2189 }
0x1439   :  { %v1695_v62 = vmul.f32 0.6931472, %v2190_v8  ;;  %v1155_v7 = vpop.permute.xlu0 %1154 }
0x143a   :  { %v1712_v6 = vsub.f32 %v2665_v4, %v1701_v1  ;;  %v1656_v4 = vpop.xlane.xlu1 %1655 }
0x143b   :  { %v1709_v13 = vsub.f32 %v2674_v17, %v1695_v62  ;;  %2193 = vlog2.f32 %v1656_v4 }
0x143c   :  { %v2192_v10 = vpop.eup %2191  ;;  %1740 = vrot.lane.b32.xlu1 %v1712_v6, %s2200_s24  ;;  %2195 = vlog2.f32 %v1659_v14 }
0x143d   :  { %v1703_v11 = vmul.f32 0.6931472, %v2192_v10  ;;  %v1163_v22 = vpop.permute.xlu0 %1162 }
0x143e   :  { %v1159_v16 = vpop.permute.xlu1 %1158 }
0x143f   :  { %v1713_v24 = vsub.f32 %v2679_v25, %v1703_v11 }
0x1440   :  { %1724 = vrot.lane.b32.xlu1 %v1708_v12, %s2201_s27 }
0x1441   :  { %1742 = vrot.lane.b32.xlu0 %v1713_v24, %s2200_s24 }
0x1444   :  { %1726 = vrot.lane.b32.xlu1 %v1709_v13, %s2201_s27 }
0x1445   :  { %v2194_v19 = vpop.eup %2193 }
0x1446   :  { %v1685_v23 = vmul.f32 0.6931472, %v2194_v19  ;;  %v2196_v2 = vpop.eup %2195 }
0x1447   :  { %v1687_v29 = vmul.f32 0.6931472, %v2196_v2 }
0x1448   :  { %1166 = vrot.lane.b32.xlu1 %v2581_v50, %s2200_s24  ;;  %v1704_v17 = vsub.f32 %v2671_v20, %v1685_v23 }
0x1449   :  { %v1705_v30 = vsub.f32 %v2684_v31, %v1687_v29  ;;  %v1169_v31 = vsel %vm159_vm1, %v1155_v7, %v1159_v16 }
0x144a   :  { %v1171_v37 = vsel %vm1170_vm10, %v1169_v31, %v1163_v22 }
0x149d   :  { %v1733_v28 = vpop.permute.xlu0 %1732 }
0x149f   :  { %v1735_v18 = vpop.permute.xlu1 %1734 }
0x14a3   :  { %v1717_v9 = vpop.permute.xlu1 %1716 }
0x14a4   :  { %v1746_v50 = vsel %vm81_vm4, %v1704_v17, %v1717_v9  ;;  %v1719_v26 = vpop.permute.xlu0 %1718 }
0x14a5   :  { %v1747_v38 = vsel %vm81_vm4, %v1705_v30, %v1719_v26 }
0x14ae   :  { %v1741_v25 = vpop.permute.xlu1 %1740 }
0x14b2   :  { %v1725_v32 = vpop.permute.xlu1 %1724 }
0x14b3   :  { %v1748_v34 = vsel %vm159_vm1, %v1746_v50, %v1725_v32  ;;  %v1743_v45 = vpop.permute.xlu0 %1742 }
0x14b4   :  { %v1751_v33 = vsel %vm1750_vm8, %v1748_v34, %v1733_v28 }
0x14b5   :  { %v1753_v36 = vsel %vm1170_vm10, %v1751_v33, %v1741_v25 }
0x14b6   :  { %v1756_v39 = vsel %vm1755_vm9, %v1753_v36, 0.0  ;;  %v1727_v20 = vpop.permute.xlu1 %1726 }
0x14b7   :  { %1758 = vst [vmem:[%s2749_s16] sm:$0xff] %v1756_v39  ;;  %v1749_v44 = vsel %vm159_vm1, %v1747_v38, %v1727_v20 }
0x14b8   :  { %v1752_v46 = vsel %vm1750_vm8, %v1749_v44, %v1735_v18 }
0x14b9   :  { %v1754_v47 = vsel %vm1170_vm10, %v1752_v46, %v1743_v45 }
0x14ba   :  { %v1757_v3 = vsel %vm1755_vm9, %v1754_v47, 0.0  ;;  %v1167_v5 = vpop.permute.xlu1 %1166 }
0x14bb   :  { %1759 = vst [vmem:[%s2749_s16 + $0x8] sm:$0xff] %v1757_v3  ;;  %v1173_v40 = vsel %vm1172_vm11, %v1171_v37, %v1167_v5 }
0x14bc   :  { %1174 = vst [vmem:[%s2750_s17] sm:$0x3] %v1173_v40 }

</bundles_post_ra>
